<compile_context>
chip_gen: v6e
topology: v6e:2x2x1
jax: 0.10.0
libtpu: 0.0.40
codegen_flags: <defaults>
</compile_context>

<pallas_src>
import numpy as np
import jax
import jax.numpy as jnp
from jax import lax
from jax.experimental import pallas as pl
from jax.experimental.pallas import tpu as pltpu

_RC = 8  # sublane chunk of the reduction axis (fixed by vreg sublane count)


def _round_up(x, m):
    return ((x + m - 1) // m) * m


def _vmem_capacity_bytes():
    """Generation-aware VMEM size (128 MiB v5e/v6e, 64 MiB v7x); safe fallback."""
    try:
        cap = getattr(pltpu.get_tpu_info(), "vmem_capacity_bytes", None)
        if cap:
            return int(cap)
    except Exception:
        pass
    return 64 << 20  # conservative (v7x-sized) fallback


# ---------------------------------------------------------------------------
# Pallas kernel: one (site tile, output feature) per grid step.
#   w_ref : (2, A, n_rc, 8, TS)   re/im-merged weights (n_out dim squeezed by BlockSpec)
#   v_ref : (2, n_rc, 8, TS)      re/im-merged shifted inputs (VMEM-resident across io)
#   o_ref : (1, 2*A, TS)          rows [0:A] real, rows [A:2A] imag
# ---------------------------------------------------------------------------
def _lptc_ng_kernel(w_ref, v_ref, o_ref):
    _, A, n_rc, RC, TS = w_ref.shape
    # lane sub-tile: bounds vreg live ranges when TS is large (TS is a multiple of 128)
    if TS <= 512:
        LC = TS
    else:
        LC = max(c for c in (512, 384, 256, 128) if TS % c == 0)
    n_lc = TS // LC

    for lc in range(n_lc):                                   # static lane chunking
        ls = pl.ds(lc * LC, LC)
        for a in range(A):                                   # static, small output-dof loop
            def chunk(c, carry, _a=a, _ls=ls):
                pre, pim = carry                             # (RC, LC) running partial sums
                vr = v_ref[0, c, :, _ls]
                vi = v_ref[1, c, :, _ls]
                wr = w_ref[0, _a, c, :, _ls]
                wi = w_ref[1, _a, c, :, _ls]
                return (pre + (wr * vr - wi * vi),
                        pim + (wr * vi + wi * vr))

            z = jnp.zeros((RC, LC), jnp.float32)
            pre, pim = lax.fori_loop(0, n_rc, chunk, (z, z), unroll=True)
            # single sublane (XLU) reduce per output row, deferred out of the R loop
            o_ref[0, a, ls] = jnp.sum(pre, axis=0)
            o_ref[0, A + a, ls] = jnp.sum(pim, axis=0)


def _eval_path(path, v):
    # v: [*grid_dims, internal_dof].  Hop (mu, nhops) gathers the value from
    # site x + nhops * e_mu, i.e. roll by -nhops along axis mu (periodic BCs).
    for mu, nhops in path:
        v = jnp.roll(v, -nhops, axis=mu)
    return v


def pack_lptc_ng_weights(weights, grid_dims):
    """One-time repack of W (call at init, NOT in the per-forward hot path).

    [n_in, n_out, n_paths, *grid, A, B] complex
      -> float32 [n_out, 2, A, R_pad/8, 8, S_pad]
    with R = n_in*n_paths*B (zero-padded to a multiple of 8) and
    S = prod(grid) (zero-padded to a multiple of 128); re/im merged so each
    grid step issues a single weight DMA.
    """
    n_in, n_out, n_paths = weights.shape[:3]
    g = len(grid_dims)
    A = weights.shape[3 + g]
    B = weights.shape[4 + g]
    S = int(np.prod(grid_dims))
    R = n_in * n_paths * B
    perm = (1, 3 + g, 0, 2, 4 + g) + tuple(range(3, 3 + g))
    w = jnp.transpose(weights, perm).reshape(n_out, A, R, S)
    w2 = jnp.stack([jnp.real(w), jnp.imag(w)], axis=1).astype(jnp.float32)  # [n_out,2,A,R,S]
    R_pad = _round_up(max(R, _RC), _RC)
    S_pad = _round_up(max(S, 128), 128)
    if (R_pad, S_pad) != (R, S):
        w2 = jnp.pad(w2, ((0, 0), (0, 0), (0, 0), (0, R_pad - R), (0, S_pad - S)))
    return w2.reshape(n_out, 2, A, R_pad // _RC, _RC, S_pad)


def _pack_v(features_in, paths, grid_dims, R_pad, S_pad):
    """Per-call pack of the path-shifted inputs as float32 [2, R_pad/8, 8, S_pad]
    (same (fi, path, b) ordering as the weight pack).  Built directly from the
    re/im planes so the whole pack fuses under jit (no complex64 intermediate stack)."""
    n_in = features_in.shape[0]
    B = features_in.shape[-1]
    S = int(np.prod(grid_dims))
    R = n_in * len(paths) * B
    planes = (jnp.real(features_in).astype(jnp.float32),
              jnp.imag(features_in).astype(jnp.float32))
    comps = []
    for plane in planes:
        rows = []
        for f in range(n_in):
            for p in paths:
                v = _eval_path(p, plane[f])                       # [*grid, B]
                rows.append(jnp.moveaxis(v, -1, 0).reshape(B, S))  # [B, S]
        comps.append(jnp.concatenate(rows, axis=0))                # [R, S]
    v = jnp.stack(comps, axis=0)                                   # [2, R, S]
    if (R_pad, S_pad) != (R, S):
        v = jnp.pad(v, ((0, 0), (0, R_pad - R), (0, S_pad - S)))
    return v.reshape(2, R_pad // _RC, _RC, S_pad)


def _pick_site_tile(S_pad, A, R_pad, vmem_cap):
    """Largest lane tile TS (multiple of 128 dividing S_pad) whose double-buffered
    footprint fits ~38% of this generation's VMEM, then shrunk so the parallel site
    axis keeps >=2 tiles (v7x megacore) and ideally >=4 while each step still moves
    >= ~2 MiB of weights (per-step overhead amortization)."""
    def step_bytes(ts):  # double-buffered W + V + out blocks, re/im merged, f32
        return 16 * ts * (A * R_pad + R_pad + A)

    budget = int(0.38 * vmem_cap)
    cands = [ts for ts in range(128, S_pad + 1, 128) if S_pad % ts == 0]
    if not cands:
        return S_pad  # S_pad < 128 cannot happen after padding; guard anyway
    fitting = [ts for ts in cands if step_bytes(ts) <= budget] or [cands[0]]

    def shrink(ts):
        smaller = [c for c in fitting if c < ts]
        return max(smaller) if smaller else ts

    ts = max(fitting)
    if S_pad // ts < 2:                          # always leave >=2 site tiles if possible
        ts = shrink(ts)
    while S_pad // ts < 4:                       # prefer >=4 while W DMA/step stays >=2 MiB
        nts = shrink(ts)
        if nts == ts or 8 * A * R_pad * nts < (2 << 20):
            break
        ts = nts
    return ts


def lptc_ng_forward(features_in, w_packed, paths, grid_dims, internal_dof):
    n_out, _, A, n_rc_w, rc_w, S_pad = w_packed.shape
    R_pad = n_rc_w * rc_w
    g = len(grid_dims)
    S = int(np.prod(grid_dims))
    R = features_in.shape[0] * len(paths) * internal_dof
    if A != internal_dof or _round_up(max(R, _RC), _RC) != R_pad:
        raise ValueError("shape mismatch between features_in/paths and packed weights")

    v_packed = _pack_v(features_in, paths, grid_dims, R_pad, S_pad)

    vmem_cap = _vmem_capacity_bytes()
    TS = _pick_site_tile(S_pad, A, R_pad, vmem_cap)
    n_s = S_pad // TS
    step_bytes = 16 * TS * (A * R_pad + R_pad + A)
    vmem_limit = int(min(0.75 * vmem_cap, max(step_bytes + (16 << 20), 32 << 20)))

    # grid = (site tile, out feature); out feature INNERMOST -> the V block index is
    # constant across consecutive steps, so V stays resident in VMEM instead of being
    # re-DMA'd n_out times.  The site axis is "parallel" for megacore sharding (v7x).
    w_spec = pl.BlockSpec((pl.Squeezed(), 2, A, n_rc_w, rc_w, TS),
                          lambda s, io: (io, 0, 0, 0, 0, s))
    v_spec = pl.BlockSpec((2, n_rc_w, rc_w, TS), lambda s, io: (0, 0, 0, s))
    o_spec = pl.BlockSpec((1, 2 * A, TS), lambda s, io: (io, 0, s))

    out = pl.pallas_call(
        _lptc_ng_kernel,
        out_shape=jax.ShapeDtypeStruct((n_out, 2 * A, S_pad), jnp.float32),
        grid_spec=pltpu.PrefetchScalarGridSpec(
            num_scalar_prefetch=0,
            grid=(n_s, n_out),
            in_specs=[w_spec, v_spec],
            out_specs=o_spec),
        compiler_params=pltpu.CompilerParams(
            dimension_semantics=("parallel", "arbitrary"),
            vmem_limit_bytes=vmem_limit),
    )(w_packed, v_packed)

    out = out[:, :, :S]                                                  # drop lattice padding
    out_c = (out[:, :A, :] + 1j * out[:, A:, :]).astype(jnp.complex64)   # [n_out, A, S]
    out_c = out_c.reshape((n_out, A) + tuple(grid_dims))
    perm_back = (0,) + tuple(range(2, 2 + g)) + (1,)
    return jnp.transpose(out_c, perm_back)                               # [n_out, *grid, idof]


if __name__ == "__main__":
    key = jax.random.PRNGKey(0)
    n_in, n_out = 2, 3
    grid_dims = (4, 4, 4, 4)
    internal_dof = 4
    paths = [[], [(0, 1)], [(1, -1)], [(2, 2)], [(3, 1), (0, -1)]]
    n_paths = len(paths)

    kw_r, kw_i, kx_r, kx_i = jax.random.split(key, 4)
    w_shape = (n_in, n_out, n_paths) + grid_dims + (internal_dof, internal_dof)
    weights = (jax.random.normal(kw_r, w_shape, dtype=jnp.float32)
               + 1j * jax.random.normal(kw_i, w_shape, dtype=jnp.float32)).astype(jnp.complex64)
    x_shape = (n_in,) + grid_dims + (internal_dof,)
    x = (jax.random.normal(kx_r, x_shape, dtype=jnp.float32)
         + 1j * jax.random.normal(kx_i, x_shape, dtype=jnp.float32)).astype(jnp.complex64)

    # ---- init-time weight pack (cached across forward calls) ----
    w_packed = jax.block_until_ready(pack_lptc_ng_weights(weights, grid_dims))

    # ---- jitted forward: per-call V packing + pallas_call fused in one XLA program ----
    fwd = jax.jit(lambda feats, w: lptc_ng_forward(feats, w, paths, grid_dims, internal_dof))
    out = jax.block_until_ready(fwd(x, w_packed))

    # pure-JAX reference (mirrors the PyTorch triple loop)
    ref = jnp.zeros((n_out,) + grid_dims + (internal_dof,), dtype=jnp.complex64)
    for fi in range(n_in):
        for io in range(n_out):
            for p_idx, path in enumerate(paths):
                vshift = _eval_path(path, x[fi])
                ref = ref.at[io].add(
                    jnp.einsum('...ab,...b->...a', weights[fi, io, p_idx], vshift))
    ref = jax.block_until_ready(ref)

    assert out.shape == ref.shape == (n_out,) + grid_dims + (internal_dof,)
    np.testing.assert_allclose(np.asarray(out), np.asarray(ref), rtol=1e-3, atol=1e-3)
    print("KERNEL_OK")
</pallas_src>

<mosaic_0001>
module attributes {stable_mosaic.version = 11 : i64} {
  func.func @_lptc_ng_kernel(%arg0: i32, %arg1: i32, %arg2: memref<1x2x4x5x8x128xf32, #tpu.memory_space<vmem>>, %arg3: memref<2x5x8x128xf32, #tpu.memory_space<vmem>>, %arg4: memref<1x8x128xf32, #tpu.memory_space<vmem>>) attributes {dimension_semantics = [#tpu.dimension_semantics<parallel>, #tpu.dimension_semantics<arbitrary>], iteration_bounds = array<i64: 2, 3>, scalar_prefetch = 0 : i64, scratch_operands = 0 : i64, tpu.core_type = #tpu.core_type<tc>, window_params = [{transform_indices = @transform_0, window_bounds = array<i64: 1, 2, 4, 5, 8, 128>}, {transform_indices = @transform_1, window_bounds = array<i64: 2, 5, 8, 128>}, {transform_indices = @transform_2, window_bounds = array<i64: 1, 8, 128>}]} {
    %cst = arith.constant 0.000000e+00 : f32
    %0 = vector.broadcast %cst : f32 to vector<8x128xf32>
    %c0_i32 = arith.constant 0 : i32
    %c0 = arith.constant 0 : index
    %1 = arith.index_cast %c0_i32 : i32 to index
    %c0_0 = arith.constant 0 : index
    %c0_1 = arith.constant 0 : index
    %2 = vector.load %arg3[%c0, %1, %c0_0, %c0_1] : memref<2x5x8x128xf32, #tpu.memory_space<vmem>>, vector<1x1x8x128xf32>
    %3 = vector.shape_cast %2 : vector<1x1x8x128xf32> to vector<8x128xf32>
    %c1 = arith.constant 1 : index
    %4 = arith.index_cast %c0_i32 : i32 to index
    %c0_2 = arith.constant 0 : index
    %c0_3 = arith.constant 0 : index
    %5 = vector.load %arg3[%c1, %4, %c0_2, %c0_3] : memref<2x5x8x128xf32, #tpu.memory_space<vmem>>, vector<1x1x8x128xf32>
    %6 = vector.shape_cast %5 : vector<1x1x8x128xf32> to vector<8x128xf32>
    %c0_4 = arith.constant 0 : index
    %c0_5 = arith.constant 0 : index
    %c0_6 = arith.constant 0 : index
    %7 = arith.index_cast %c0_i32 : i32 to index
    %c0_7 = arith.constant 0 : index
    %c0_8 = arith.constant 0 : index
    %8 = vector.load %arg2[%c0_4, %c0_5, %c0_6, %7, %c0_7, %c0_8] : memref<1x2x4x5x8x128xf32, #tpu.memory_space<vmem>>, vector<1x1x1x1x8x128xf32>
    %9 = vector.shape_cast %8 : vector<1x1x1x1x8x128xf32> to vector<8x128xf32>
    %c0_9 = arith.constant 0 : index
    %c1_10 = arith.constant 1 : index
    %c0_11 = arith.constant 0 : index
    %10 = arith.index_cast %c0_i32 : i32 to index
    %c0_12 = arith.constant 0 : index
    %c0_13 = arith.constant 0 : index
    %11 = vector.load %arg2[%c0_9, %c1_10, %c0_11, %10, %c0_12, %c0_13] : memref<1x2x4x5x8x128xf32, #tpu.memory_space<vmem>>, vector<1x1x1x1x8x128xf32>
    %12 = vector.shape_cast %11 : vector<1x1x1x1x8x128xf32> to vector<8x128xf32>
    %13 = arith.mulf %9, %3 : vector<8x128xf32>
    %14 = arith.mulf %12, %6 : vector<8x128xf32>
    %15 = arith.subf %13, %14 : vector<8x128xf32>
    %16 = arith.addf %0, %15 : vector<8x128xf32>
    %17 = arith.mulf %9, %6 : vector<8x128xf32>
    %18 = arith.mulf %12, %3 : vector<8x128xf32>
    %19 = arith.addf %17, %18 : vector<8x128xf32>
    %20 = arith.addf %0, %19 : vector<8x128xf32>
    %c1_i32 = arith.constant 1 : i32
    %c0_14 = arith.constant 0 : index
    %21 = arith.index_cast %c1_i32 : i32 to index
    %c0_15 = arith.constant 0 : index
    %c0_16 = arith.constant 0 : index
    %22 = vector.load %arg3[%c0_14, %21, %c0_15, %c0_16] : memref<2x5x8x128xf32, #tpu.memory_space<vmem>>, vector<1x1x8x128xf32>
    %23 = vector.shape_cast %22 : vector<1x1x8x128xf32> to vector<8x128xf32>
    %c1_17 = arith.constant 1 : index
    %24 = arith.index_cast %c1_i32 : i32 to index
    %c0_18 = arith.constant 0 : index
    %c0_19 = arith.constant 0 : index
    %25 = vector.load %arg3[%c1_17, %24, %c0_18, %c0_19] : memref<2x5x8x128xf32, #tpu.memory_space<vmem>>, vector<1x1x8x128xf32>
    %26 = vector.shape_cast %25 : vector<1x1x8x128xf32> to vector<8x128xf32>
    %c0_20 = arith.constant 0 : index
    %c0_21 = arith.constant 0 : index
    %c0_22 = arith.constant 0 : index
    %27 = arith.index_cast %c1_i32 : i32 to index
    %c0_23 = arith.constant 0 : index
    %c0_24 = arith.constant 0 : index
    %28 = vector.load %arg2[%c0_20, %c0_21, %c0_22, %27, %c0_23, %c0_24] : memref<1x2x4x5x8x128xf32, #tpu.memory_space<vmem>>, vector<1x1x1x1x8x128xf32>
    %29 = vector.shape_cast %28 : vector<1x1x1x1x8x128xf32> to vector<8x128xf32>
    %c0_25 = arith.constant 0 : index
    %c1_26 = arith.constant 1 : index
    %c0_27 = arith.constant 0 : index
    %30 = arith.index_cast %c1_i32 : i32 to index
    %c0_28 = arith.constant 0 : index
    %c0_29 = arith.constant 0 : index
    %31 = vector.load %arg2[%c0_25, %c1_26, %c0_27, %30, %c0_28, %c0_29] : memref<1x2x4x5x8x128xf32, #tpu.memory_space<vmem>>, vector<1x1x1x1x8x128xf32>
    %32 = vector.shape_cast %31 : vector<1x1x1x1x8x128xf32> to vector<8x128xf32>
    %33 = arith.mulf %29, %23 : vector<8x128xf32>
    %34 = arith.mulf %32, %26 : vector<8x128xf32>
    %35 = arith.subf %33, %34 : vector<8x128xf32>
    %36 = arith.addf %16, %35 : vector<8x128xf32>
    %37 = arith.mulf %29, %26 : vector<8x128xf32>
    %38 = arith.mulf %32, %23 : vector<8x128xf32>
    %39 = arith.addf %37, %38 : vector<8x128xf32>
    %40 = arith.addf %20, %39 : vector<8x128xf32>
    %c2_i32 = arith.constant 2 : i32
    %c0_30 = arith.constant 0 : index
    %41 = arith.index_cast %c2_i32 : i32 to index
    %c0_31 = arith.constant 0 : index
    %c0_32 = arith.constant 0 : index
    %42 = vector.load %arg3[%c0_30, %41, %c0_31, %c0_32] : memref<2x5x8x128xf32, #tpu.memory_space<vmem>>, vector<1x1x8x128xf32>
    %43 = vector.shape_cast %42 : vector<1x1x8x128xf32> to vector<8x128xf32>
    %c1_33 = arith.constant 1 : index
    %44 = arith.index_cast %c2_i32 : i32 to index
    %c0_34 = arith.constant 0 : index
    %c0_35 = arith.constant 0 : index
    %45 = vector.load %arg3[%c1_33, %44, %c0_34, %c0_35] : memref<2x5x8x128xf32, #tpu.memory_space<vmem>>, vector<1x1x8x128xf32>
    %46 = vector.shape_cast %45 : vector<1x1x8x128xf32> to vector<8x128xf32>
    %c0_36 = arith.constant 0 : index
    %c0_37 = arith.constant 0 : index
    %c0_38 = arith.constant 0 : index
    %47 = arith.index_cast %c2_i32 : i32 to index
    %c0_39 = arith.constant 0 : index
    %c0_40 = arith.constant 0 : index
    %48 = vector.load %arg2[%c0_36, %c0_37, %c0_38, %47, %c0_39, %c0_40] : memref<1x2x4x5x8x128xf32, #tpu.memory_space<vmem>>, vector<1x1x1x1x8x128xf32>
    %49 = vector.shape_cast %48 : vector<1x1x1x1x8x128xf32> to vector<8x128xf32>
    %c0_41 = arith.constant 0 : index
    %c1_42 = arith.constant 1 : index
    %c0_43 = arith.constant 0 : index
    %50 = arith.index_cast %c2_i32 : i32 to index
    %c0_44 = arith.constant 0 : index
    %c0_45 = arith.constant 0 : index
    %51 = vector.load %arg2[%c0_41, %c1_42, %c0_43, %50, %c0_44, %c0_45] : memref<1x2x4x5x8x128xf32, #tpu.memory_space<vmem>>, vector<1x1x1x1x8x128xf32>
    %52 = vector.shape_cast %51 : vector<1x1x1x1x8x128xf32> to vector<8x128xf32>
    %53 = arith.mulf %49, %43 : vector<8x128xf32>
    %54 = arith.mulf %52, %46 : vector<8x128xf32>
    %55 = arith.subf %53, %54 : vector<8x128xf32>
    %56 = arith.addf %36, %55 : vector<8x128xf32>
    %57 = arith.mulf %49, %46 : vector<8x128xf32>
    %58 = arith.mulf %52, %43 : vector<8x128xf32>
    %59 = arith.addf %57, %58 : vector<8x128xf32>
    %60 = arith.addf %40, %59 : vector<8x128xf32>
    %c3_i32 = arith.constant 3 : i32
    %c0_46 = arith.constant 0 : index
    %61 = arith.index_cast %c3_i32 : i32 to index
    %c0_47 = arith.constant 0 : index
    %c0_48 = arith.constant 0 : index
    %62 = vector.load %arg3[%c0_46, %61, %c0_47, %c0_48] : memref<2x5x8x128xf32, #tpu.memory_space<vmem>>, vector<1x1x8x128xf32>
    %63 = vector.shape_cast %62 : vector<1x1x8x128xf32> to vector<8x128xf32>
    %c1_49 = arith.constant 1 : index
    %64 = arith.index_cast %c3_i32 : i32 to index
    %c0_50 = arith.constant 0 : index
    %c0_51 = arith.constant 0 : index
    %65 = vector.load %arg3[%c1_49, %64, %c0_50, %c0_51] : memref<2x5x8x128xf32, #tpu.memory_space<vmem>>, vector<1x1x8x128xf32>
    %66 = vector.shape_cast %65 : vector<1x1x8x128xf32> to vector<8x128xf32>
    %c0_52 = arith.constant 0 : index
    %c0_53 = arith.constant 0 : index
    %c0_54 = arith.constant 0 : index
    %67 = arith.index_cast %c3_i32 : i32 to index
    %c0_55 = arith.constant 0 : index
    %c0_56 = arith.constant 0 : index
    %68 = vector.load %arg2[%c0_52, %c0_53, %c0_54, %67, %c0_55, %c0_56] : memref<1x2x4x5x8x128xf32, #tpu.memory_space<vmem>>, vector<1x1x1x1x8x128xf32>
    %69 = vector.shape_cast %68 : vector<1x1x1x1x8x128xf32> to vector<8x128xf32>
    %c0_57 = arith.constant 0 : index
    %c1_58 = arith.constant 1 : index
    %c0_59 = arith.constant 0 : index
    %70 = arith.index_cast %c3_i32 : i32 to index
    %c0_60 = arith.constant 0 : index
    %c0_61 = arith.constant 0 : index
    %71 = vector.load %arg2[%c0_57, %c1_58, %c0_59, %70, %c0_60, %c0_61] : memref<1x2x4x5x8x128xf32, #tpu.memory_space<vmem>>, vector<1x1x1x1x8x128xf32>
    %72 = vector.shape_cast %71 : vector<1x1x1x1x8x128xf32> to vector<8x128xf32>
    %73 = arith.mulf %69, %63 : vector<8x128xf32>
    %74 = arith.mulf %72, %66 : vector<8x128xf32>
    %75 = arith.subf %73, %74 : vector<8x128xf32>
    %76 = arith.addf %56, %75 : vector<8x128xf32>
    %77 = arith.mulf %69, %66 : vector<8x128xf32>
    %78 = arith.mulf %72, %63 : vector<8x128xf32>
    %79 = arith.addf %77, %78 : vector<8x128xf32>
    %80 = arith.addf %60, %79 : vector<8x128xf32>
    %c4_i32 = arith.constant 4 : i32
    %c0_62 = arith.constant 0 : index
    %81 = arith.index_cast %c4_i32 : i32 to index
    %c0_63 = arith.constant 0 : index
    %c0_64 = arith.constant 0 : index
    %82 = vector.load %arg3[%c0_62, %81, %c0_63, %c0_64] : memref<2x5x8x128xf32, #tpu.memory_space<vmem>>, vector<1x1x8x128xf32>
    %83 = vector.shape_cast %82 : vector<1x1x8x128xf32> to vector<8x128xf32>
    %c1_65 = arith.constant 1 : index
    %84 = arith.index_cast %c4_i32 : i32 to index
    %c0_66 = arith.constant 0 : index
    %c0_67 = arith.constant 0 : index
    %85 = vector.load %arg3[%c1_65, %84, %c0_66, %c0_67] : memref<2x5x8x128xf32, #tpu.memory_space<vmem>>, vector<1x1x8x128xf32>
    %86 = vector.shape_cast %85 : vector<1x1x8x128xf32> to vector<8x128xf32>
    %c0_68 = arith.constant 0 : index
    %c0_69 = arith.constant 0 : index
    %c0_70 = arith.constant 0 : index
    %87 = arith.index_cast %c4_i32 : i32 to index
    %c0_71 = arith.constant 0 : index
    %c0_72 = arith.constant 0 : index
    %88 = vector.load %arg2[%c0_68, %c0_69, %c0_70, %87, %c0_71, %c0_72] : memref<1x2x4x5x8x128xf32, #tpu.memory_space<vmem>>, vector<1x1x1x1x8x128xf32>
    %89 = vector.shape_cast %88 : vector<1x1x1x1x8x128xf32> to vector<8x128xf32>
    %c0_73 = arith.constant 0 : index
    %c1_74 = arith.constant 1 : index
    %c0_75 = arith.constant 0 : index
    %90 = arith.index_cast %c4_i32 : i32 to index
    %c0_76 = arith.constant 0 : index
    %c0_77 = arith.constant 0 : index
    %91 = vector.load %arg2[%c0_73, %c1_74, %c0_75, %90, %c0_76, %c0_77] : memref<1x2x4x5x8x128xf32, #tpu.memory_space<vmem>>, vector<1x1x1x1x8x128xf32>
    %92 = vector.shape_cast %91 : vector<1x1x1x1x8x128xf32> to vector<8x128xf32>
    %93 = arith.mulf %89, %83 : vector<8x128xf32>
    %94 = arith.mulf %92, %86 : vector<8x128xf32>
    %95 = arith.subf %93, %94 : vector<8x128xf32>
    %96 = arith.addf %76, %95 : vector<8x128xf32>
    %97 = arith.mulf %89, %86 : vector<8x128xf32>
    %98 = arith.mulf %92, %83 : vector<8x128xf32>
    %99 = arith.addf %97, %98 : vector<8x128xf32>
    %100 = arith.addf %80, %99 : vector<8x128xf32>
    %c5_i32 = arith.constant 5 : i32
    %cst_78 = arith.constant dense<0.000000e+00> : vector<128xf32>
    %101 = vector.multi_reduction <add>, %96, %cst_78 [0] : vector<8x128xf32> to vector<128xf32>
    %c0_79 = arith.constant 0 : index
    %c0_80 = arith.constant 0 : index
    %c0_81 = arith.constant 0 : index
    %102 = vector.load %arg4[%c0_79, %c0_80, %c0_81] : memref<1x8x128xf32, #tpu.memory_space<vmem>>, vector<1x1x128xf32>
    %103 = vector.shape_cast %102 : vector<1x1x128xf32> to vector<128xf32>
    %104 = vector.shape_cast %101 : vector<128xf32> to vector<1x1x128xf32>
    tpu.vector_store %arg4[%c0_79, %c0_80, %c0_81], %104 {strides = array<i32>} : memref<1x8x128xf32, #tpu.memory_space<vmem>>, vector<1x1x128xf32>,
    %cst_82 = arith.constant dense<0.000000e+00> : vector<128xf32>
    %105 = vector.multi_reduction <add>, %100, %cst_82 [0] : vector<8x128xf32> to vector<128xf32>
    %c0_83 = arith.constant 0 : index
    %c4 = arith.constant 4 : index
    %c0_84 = arith.constant 0 : index
    %106 = vector.load %arg4[%c0_83, %c4, %c0_84] : memref<1x8x128xf32, #tpu.memory_space<vmem>>, vector<1x1x128xf32>
    %107 = vector.shape_cast %106 : vector<1x1x128xf32> to vector<128xf32>
    %108 = vector.shape_cast %105 : vector<128xf32> to vector<1x1x128xf32>
    tpu.vector_store %arg4[%c0_83, %c4, %c0_84], %108 {strides = array<i32>} : memref<1x8x128xf32, #tpu.memory_space<vmem>>, vector<1x1x128xf32>,
    %cst_85 = arith.constant 0.000000e+00 : f32
    %109 = vector.broadcast %cst_85 : f32 to vector<8x128xf32>
    %c0_i32_86 = arith.constant 0 : i32
    %c0_87 = arith.constant 0 : index
    %110 = arith.index_cast %c0_i32_86 : i32 to index
    %c0_88 = arith.constant 0 : index
    %c0_89 = arith.constant 0 : index
    %111 = vector.load %arg3[%c0_87, %110, %c0_88, %c0_89] : memref<2x5x8x128xf32, #tpu.memory_space<vmem>>, vector<1x1x8x128xf32>
    %112 = vector.shape_cast %111 : vector<1x1x8x128xf32> to vector<8x128xf32>
    %c1_90 = arith.constant 1 : index
    %113 = arith.index_cast %c0_i32_86 : i32 to index
    %c0_91 = arith.constant 0 : index
    %c0_92 = arith.constant 0 : index
    %114 = vector.load %arg3[%c1_90, %113, %c0_91, %c0_92] : memref<2x5x8x128xf32, #tpu.memory_space<vmem>>, vector<1x1x8x128xf32>
    %115 = vector.shape_cast %114 : vector<1x1x8x128xf32> to vector<8x128xf32>
    %c0_93 = arith.constant 0 : index
    %c0_94 = arith.constant 0 : index
    %c1_95 = arith.constant 1 : index
    %116 = arith.index_cast %c0_i32_86 : i32 to index
    %c0_96 = arith.constant 0 : index
    %c0_97 = arith.constant 0 : index
    %117 = vector.load %arg2[%c0_93, %c0_94, %c1_95, %116, %c0_96, %c0_97] : memref<1x2x4x5x8x128xf32, #tpu.memory_space<vmem>>, vector<1x1x1x1x8x128xf32>
    %118 = vector.shape_cast %117 : vector<1x1x1x1x8x128xf32> to vector<8x128xf32>
    %c0_98 = arith.constant 0 : index
    %c1_99 = arith.constant 1 : index
    %c1_100 = arith.constant 1 : index
    %119 = arith.index_cast %c0_i32_86 : i32 to index
    %c0_101 = arith.constant 0 : index
    %c0_102 = arith.constant 0 : index
    %120 = vector.load %arg2[%c0_98, %c1_99, %c1_100, %119, %c0_101, %c0_102] : memref<1x2x4x5x8x128xf32, #tpu.memory_space<vmem>>, vector<1x1x1x1x8x128xf32>
    %121 = vector.shape_cast %120 : vector<1x1x1x1x8x128xf32> to vector<8x128xf32>
    %122 = arith.mulf %118, %112 : vector<8x128xf32>
    %123 = arith.mulf %121, %115 : vector<8x128xf32>
    %124 = arith.subf %122, %123 : vector<8x128xf32>
    %125 = arith.addf %109, %124 : vector<8x128xf32>
    %126 = arith.mulf %118, %115 : vector<8x128xf32>
    %127 = arith.mulf %121, %112 : vector<8x128xf32>
    %128 = arith.addf %126, %127 : vector<8x128xf32>
    %129 = arith.addf %109, %128 : vector<8x128xf32>
    %c1_i32_103 = arith.constant 1 : i32
    %c0_104 = arith.constant 0 : index
    %130 = arith.index_cast %c1_i32_103 : i32 to index
    %c0_105 = arith.constant 0 : index
    %c0_106 = arith.constant 0 : index
    %131 = vector.load %arg3[%c0_104, %130, %c0_105, %c0_106] : memref<2x5x8x128xf32, #tpu.memory_space<vmem>>, vector<1x1x8x128xf32>
    %132 = vector.shape_cast %131 : vector<1x1x8x128xf32> to vector<8x128xf32>
    %c1_107 = arith.constant 1 : index
    %133 = arith.index_cast %c1_i32_103 : i32 to index
    %c0_108 = arith.constant 0 : index
    %c0_109 = arith.constant 0 : index
    %134 = vector.load %arg3[%c1_107, %133, %c0_108, %c0_109] : memref<2x5x8x128xf32, #tpu.memory_space<vmem>>, vector<1x1x8x128xf32>
    %135 = vector.shape_cast %134 : vector<1x1x8x128xf32> to vector<8x128xf32>
    %c0_110 = arith.constant 0 : index
    %c0_111 = arith.constant 0 : index
    %c1_112 = arith.constant 1 : index
    %136 = arith.index_cast %c1_i32_103 : i32 to index
    %c0_113 = arith.constant 0 : index
    %c0_114 = arith.constant 0 : index
    %137 = vector.load %arg2[%c0_110, %c0_111, %c1_112, %136, %c0_113, %c0_114] : memref<1x2x4x5x8x128xf32, #tpu.memory_space<vmem>>, vector<1x1x1x1x8x128xf32>
    %138 = vector.shape_cast %137 : vector<1x1x1x1x8x128xf32> to vector<8x128xf32>
    %c0_115 = arith.constant 0 : index
    %c1_116 = arith.constant 1 : index
    %c1_117 = arith.constant 1 : index
    %139 = arith.index_cast %c1_i32_103 : i32 to index
    %c0_118 = arith.constant 0 : index
    %c0_119 = arith.constant 0 : index
    %140 = vector.load %arg2[%c0_115, %c1_116, %c1_117, %139, %c0_118, %c0_119] : memref<1x2x4x5x8x128xf32, #tpu.memory_space<vmem>>, vector<1x1x1x1x8x128xf32>
    %141 = vector.shape_cast %140 : vector<1x1x1x1x8x128xf32> to vector<8x128xf32>
    %142 = arith.mulf %138, %132 : vector<8x128xf32>
    %143 = arith.mulf %141, %135 : vector<8x128xf32>
    %144 = arith.subf %142, %143 : vector<8x128xf32>
    %145 = arith.addf %125, %144 : vector<8x128xf32>
    %146 = arith.mulf %138, %135 : vector<8x128xf32>
    %147 = arith.mulf %141, %132 : vector<8x128xf32>
    %148 = arith.addf %146, %147 : vector<8x128xf32>
    %149 = arith.addf %129, %148 : vector<8x128xf32>
    %c2_i32_120 = arith.constant 2 : i32
    %c0_121 = arith.constant 0 : index
    %150 = arith.index_cast %c2_i32_120 : i32 to index
    %c0_122 = arith.constant 0 : index
    %c0_123 = arith.constant 0 : index
    %151 = vector.load %arg3[%c0_121, %150, %c0_122, %c0_123] : memref<2x5x8x128xf32, #tpu.memory_space<vmem>>, vector<1x1x8x128xf32>
    %152 = vector.shape_cast %151 : vector<1x1x8x128xf32> to vector<8x128xf32>
    %c1_124 = arith.constant 1 : index
    %153 = arith.index_cast %c2_i32_120 : i32 to index
    %c0_125 = arith.constant 0 : index
    %c0_126 = arith.constant 0 : index
    %154 = vector.load %arg3[%c1_124, %153, %c0_125, %c0_126] : memref<2x5x8x128xf32, #tpu.memory_space<vmem>>, vector<1x1x8x128xf32>
    %155 = vector.shape_cast %154 : vector<1x1x8x128xf32> to vector<8x128xf32>
    %c0_127 = arith.constant 0 : index
    %c0_128 = arith.constant 0 : index
    %c1_129 = arith.constant 1 : index
    %156 = arith.index_cast %c2_i32_120 : i32 to index
    %c0_130 = arith.constant 0 : index
    %c0_131 = arith.constant 0 : index
    %157 = vector.load %arg2[%c0_127, %c0_128, %c1_129, %156, %c0_130, %c0_131] : memref<1x2x4x5x8x128xf32, #tpu.memory_space<vmem>>, vector<1x1x1x1x8x128xf32>
    %158 = vector.shape_cast %157 : vector<1x1x1x1x8x128xf32> to vector<8x128xf32>
    %c0_132 = arith.constant 0 : index
    %c1_133 = arith.constant 1 : index
    %c1_134 = arith.constant 1 : index
    %159 = arith.index_cast %c2_i32_120 : i32 to index
    %c0_135 = arith.constant 0 : index
    %c0_136 = arith.constant 0 : index
    %160 = vector.load %arg2[%c0_132, %c1_133, %c1_134, %159, %c0_135, %c0_136] : memref<1x2x4x5x8x128xf32, #tpu.memory_space<vmem>>, vector<1x1x1x1x8x128xf32>
    %161 = vector.shape_cast %160 : vector<1x1x1x1x8x128xf32> to vector<8x128xf32>
    %162 = arith.mulf %158, %152 : vector<8x128xf32>
    %163 = arith.mulf %161, %155 : vector<8x128xf32>
    %164 = arith.subf %162, %163 : vector<8x128xf32>
    %165 = arith.addf %145, %164 : vector<8x128xf32>
    %166 = arith.mulf %158, %155 : vector<8x128xf32>
    %167 = arith.mulf %161, %152 : vector<8x128xf32>
    %168 = arith.addf %166, %167 : vector<8x128xf32>
    %169 = arith.addf %149, %168 : vector<8x128xf32>
    %c3_i32_137 = arith.constant 3 : i32
    %c0_138 = arith.constant 0 : index
    %170 = arith.index_cast %c3_i32_137 : i32 to index
    %c0_139 = arith.constant 0 : index
    %c0_140 = arith.constant 0 : index
    %171 = vector.load %arg3[%c0_138, %170, %c0_139, %c0_140] : memref<2x5x8x128xf32, #tpu.memory_space<vmem>>, vector<1x1x8x128xf32>
    %172 = vector.shape_cast %171 : vector<1x1x8x128xf32> to vector<8x128xf32>
    %c1_141 = arith.constant 1 : index
    %173 = arith.index_cast %c3_i32_137 : i32 to index
    %c0_142 = arith.constant 0 : index
    %c0_143 = arith.constant 0 : index
    %174 = vector.load %arg3[%c1_141, %173, %c0_142, %c0_143] : memref<2x5x8x128xf32, #tpu.memory_space<vmem>>, vector<1x1x8x128xf32>
    %175 = vector.shape_cast %174 : vector<1x1x8x128xf32> to vector<8x128xf32>
    %c0_144 = arith.constant 0 : index
    %c0_145 = arith.constant 0 : index
    %c1_146 = arith.constant 1 : index
    %176 = arith.index_cast %c3_i32_137 : i32 to index
    %c0_147 = arith.constant 0 : index
    %c0_148 = arith.constant 0 : index
    %177 = vector.load %arg2[%c0_144, %c0_145, %c1_146, %176, %c0_147, %c0_148] : memref<1x2x4x5x8x128xf32, #tpu.memory_space<vmem>>, vector<1x1x1x1x8x128xf32>
    %178 = vector.shape_cast %177 : vector<1x1x1x1x8x128xf32> to vector<8x128xf32>
    %c0_149 = arith.constant 0 : index
    %c1_150 = arith.constant 1 : index
    %c1_151 = arith.constant 1 : index
    %179 = arith.index_cast %c3_i32_137 : i32 to index
    %c0_152 = arith.constant 0 : index
    %c0_153 = arith.constant 0 : index
    %180 = vector.load %arg2[%c0_149, %c1_150, %c1_151, %179, %c0_152, %c0_153] : memref<1x2x4x5x8x128xf32, #tpu.memory_space<vmem>>, vector<1x1x1x1x8x128xf32>
    %181 = vector.shape_cast %180 : vector<1x1x1x1x8x128xf32> to vector<8x128xf32>
    %182 = arith.mulf %178, %172 : vector<8x128xf32>
    %183 = arith.mulf %181, %175 : vector<8x128xf32>
    %184 = arith.subf %182, %183 : vector<8x128xf32>
    %185 = arith.addf %165, %184 : vector<8x128xf32>
    %186 = arith.mulf %178, %175 : vector<8x128xf32>
    %187 = arith.mulf %181, %172 : vector<8x128xf32>
    %188 = arith.addf %186, %187 : vector<8x128xf32>
    %189 = arith.addf %169, %188 : vector<8x128xf32>
    %c4_i32_154 = arith.constant 4 : i32
    %c0_155 = arith.constant 0 : index
    %190 = arith.index_cast %c4_i32_154 : i32 to index
    %c0_156 = arith.constant 0 : index
    %c0_157 = arith.constant 0 : index
    %191 = vector.load %arg3[%c0_155, %190, %c0_156, %c0_157] : memref<2x5x8x128xf32, #tpu.memory_space<vmem>>, vector<1x1x8x128xf32>
    %192 = vector.shape_cast %191 : vector<1x1x8x128xf32> to vector<8x128xf32>
    %c1_158 = arith.constant 1 : index
    %193 = arith.index_cast %c4_i32_154 : i32 to index
    %c0_159 = arith.constant 0 : index
    %c0_160 = arith.constant 0 : index
    %194 = vector.load %arg3[%c1_158, %193, %c0_159, %c0_160] : memref<2x5x8x128xf32, #tpu.memory_space<vmem>>, vector<1x1x8x128xf32>
    %195 = vector.shape_cast %194 : vector<1x1x8x128xf32> to vector<8x128xf32>
    %c0_161 = arith.constant 0 : index
    %c0_162 = arith.constant 0 : index
    %c1_163 = arith.constant 1 : index
    %196 = arith.index_cast %c4_i32_154 : i32 to index
    %c0_164 = arith.constant 0 : index
    %c0_165 = arith.constant 0 : index
    %197 = vector.load %arg2[%c0_161, %c0_162, %c1_163, %196, %c0_164, %c0_165] : memref<1x2x4x5x8x128xf32, #tpu.memory_space<vmem>>, vector<1x1x1x1x8x128xf32>
    %198 = vector.shape_cast %197 : vector<1x1x1x1x8x128xf32> to vector<8x128xf32>
    %c0_166 = arith.constant 0 : index
    %c1_167 = arith.constant 1 : index
    %c1_168 = arith.constant 1 : index
    %199 = arith.index_cast %c4_i32_154 : i32 to index
    %c0_169 = arith.constant 0 : index
    %c0_170 = arith.constant 0 : index
    %200 = vector.load %arg2[%c0_166, %c1_167, %c1_168, %199, %c0_169, %c0_170] : memref<1x2x4x5x8x128xf32, #tpu.memory_space<vmem>>, vector<1x1x1x1x8x128xf32>
    %201 = vector.shape_cast %200 : vector<1x1x1x1x8x128xf32> to vector<8x128xf32>
    %202 = arith.mulf %198, %192 : vector<8x128xf32>
    %203 = arith.mulf %201, %195 : vector<8x128xf32>
    %204 = arith.subf %202, %203 : vector<8x128xf32>
    %205 = arith.addf %185, %204 : vector<8x128xf32>
    %206 = arith.mulf %198, %195 : vector<8x128xf32>
    %207 = arith.mulf %201, %192 : vector<8x128xf32>
    %208 = arith.addf %206, %207 : vector<8x128xf32>
    %209 = arith.addf %189, %208 : vector<8x128xf32>
    %c5_i32_171 = arith.constant 5 : i32
    %cst_172 = arith.constant dense<0.000000e+00> : vector<128xf32>
    %210 = vector.multi_reduction <add>, %205, %cst_172 [0] : vector<8x128xf32> to vector<128xf32>
    %c0_173 = arith.constant 0 : index
    %c1_174 = arith.constant 1 : index
    %c0_175 = arith.constant 0 : index
    %211 = vector.load %arg4[%c0_173, %c1_174, %c0_175] : memref<1x8x128xf32, #tpu.memory_space<vmem>>, vector<1x1x128xf32>
    %212 = vector.shape_cast %211 : vector<1x1x128xf32> to vector<128xf32>
    %213 = vector.shape_cast %210 : vector<128xf32> to vector<1x1x128xf32>
    tpu.vector_store %arg4[%c0_173, %c1_174, %c0_175], %213 {strides = array<i32>} : memref<1x8x128xf32, #tpu.memory_space<vmem>>, vector<1x1x128xf32>,
    %cst_176 = arith.constant dense<0.000000e+00> : vector<128xf32>
    %214 = vector.multi_reduction <add>, %209, %cst_176 [0] : vector<8x128xf32> to vector<128xf32>
    %c0_177 = arith.constant 0 : index
    %c5 = arith.constant 5 : index
    %c0_178 = arith.constant 0 : index
    %215 = vector.load %arg4[%c0_177, %c5, %c0_178] : memref<1x8x128xf32, #tpu.memory_space<vmem>>, vector<1x1x128xf32>
    %216 = vector.shape_cast %215 : vector<1x1x128xf32> to vector<128xf32>
    %217 = vector.shape_cast %214 : vector<128xf32> to vector<1x1x128xf32>
    tpu.vector_store %arg4[%c0_177, %c5, %c0_178], %217 {strides = array<i32>} : memref<1x8x128xf32, #tpu.memory_space<vmem>>, vector<1x1x128xf32>,
    %cst_179 = arith.constant 0.000000e+00 : f32
    %218 = vector.broadcast %cst_179 : f32 to vector<8x128xf32>
    %c0_i32_180 = arith.constant 0 : i32
    %c0_181 = arith.constant 0 : index
    %219 = arith.index_cast %c0_i32_180 : i32 to index
    %c0_182 = arith.constant 0 : index
    %c0_183 = arith.constant 0 : index
    %220 = vector.load %arg3[%c0_181, %219, %c0_182, %c0_183] : memref<2x5x8x128xf32, #tpu.memory_space<vmem>>, vector<1x1x8x128xf32>
    %221 = vector.shape_cast %220 : vector<1x1x8x128xf32> to vector<8x128xf32>
    %c1_184 = arith.constant 1 : index
    %222 = arith.index_cast %c0_i32_180 : i32 to index
    %c0_185 = arith.constant 0 : index
    %c0_186 = arith.constant 0 : index
    %223 = vector.load %arg3[%c1_184, %222, %c0_185, %c0_186] : memref<2x5x8x128xf32, #tpu.memory_space<vmem>>, vector<1x1x8x128xf32>
    %224 = vector.shape_cast %223 : vector<1x1x8x128xf32> to vector<8x128xf32>
    %c0_187 = arith.constant 0 : index
    %c0_188 = arith.constant 0 : index
    %c2 = arith.constant 2 : index
    %225 = arith.index_cast %c0_i32_180 : i32 to index
    %c0_189 = arith.constant 0 : index
    %c0_190 = arith.constant 0 : index
    %226 = vector.load %arg2[%c0_187, %c0_188, %c2, %225, %c0_189, %c0_190] : memref<1x2x4x5x8x128xf32, #tpu.memory_space<vmem>>, vector<1x1x1x1x8x128xf32>
    %227 = vector.shape_cast %226 : vector<1x1x1x1x8x128xf32> to vector<8x128xf32>
    %c0_191 = arith.constant 0 : index
    %c1_192 = arith.constant 1 : index
    %c2_193 = arith.constant 2 : index
    %228 = arith.index_cast %c0_i32_180 : i32 to index
    %c0_194 = arith.constant 0 : index
    %c0_195 = arith.constant 0 : index
    %229 = vector.load %arg2[%c0_191, %c1_192, %c2_193, %228, %c0_194, %c0_195] : memref<1x2x4x5x8x128xf32, #tpu.memory_space<vmem>>, vector<1x1x1x1x8x128xf32>
    %230 = vector.shape_cast %229 : vector<1x1x1x1x8x128xf32> to vector<8x128xf32>
    %231 = arith.mulf %227, %221 : vector<8x128xf32>
    %232 = arith.mulf %230, %224 : vector<8x128xf32>
    %233 = arith.subf %231, %232 : vector<8x128xf32>
    %234 = arith.addf %218, %233 : vector<8x128xf32>
    %235 = arith.mulf %227, %224 : vector<8x128xf32>
    %236 = arith.mulf %230, %221 : vector<8x128xf32>
    %237 = arith.addf %235, %236 : vector<8x128xf32>
    %238 = arith.addf %218, %237 : vector<8x128xf32>
    %c1_i32_196 = arith.constant 1 : i32
    %c0_197 = arith.constant 0 : index
    %239 = arith.index_cast %c1_i32_196 : i32 to index
    %c0_198 = arith.constant 0 : index
    %c0_199 = arith.constant 0 : index
    %240 = vector.load %arg3[%c0_197, %239, %c0_198, %c0_199] : memref<2x5x8x128xf32, #tpu.memory_space<vmem>>, vector<1x1x8x128xf32>
    %241 = vector.shape_cast %240 : vector<1x1x8x128xf32> to vector<8x128xf32>
    %c1_200 = arith.constant 1 : index
    %242 = arith.index_cast %c1_i32_196 : i32 to index
    %c0_201 = arith.constant 0 : index
    %c0_202 = arith.constant 0 : index
    %243 = vector.load %arg3[%c1_200, %242, %c0_201, %c0_202] : memref<2x5x8x128xf32, #tpu.memory_space<vmem>>, vector<1x1x8x128xf32>
    %244 = vector.shape_cast %243 : vector<1x1x8x128xf32> to vector<8x128xf32>
    %c0_203 = arith.constant 0 : index
    %c0_204 = arith.constant 0 : index
    %c2_205 = arith.constant 2 : index
    %245 = arith.index_cast %c1_i32_196 : i32 to index
    %c0_206 = arith.constant 0 : index
    %c0_207 = arith.constant 0 : index
    %246 = vector.load %arg2[%c0_203, %c0_204, %c2_205, %245, %c0_206, %c0_207] : memref<1x2x4x5x8x128xf32, #tpu.memory_space<vmem>>, vector<1x1x1x1x8x128xf32>
    %247 = vector.shape_cast %246 : vector<1x1x1x1x8x128xf32> to vector<8x128xf32>
    %c0_208 = arith.constant 0 : index
    %c1_209 = arith.constant 1 : index
    %c2_210 = arith.constant 2 : index
    %248 = arith.index_cast %c1_i32_196 : i32 to index
    %c0_211 = arith.constant 0 : index
    %c0_212 = arith.constant 0 : index
    %249 = vector.load %arg2[%c0_208, %c1_209, %c2_210, %248, %c0_211, %c0_212] : memref<1x2x4x5x8x128xf32, #tpu.memory_space<vmem>>, vector<1x1x1x1x8x128xf32>
    %250 = vector.shape_cast %249 : vector<1x1x1x1x8x128xf32> to vector<8x128xf32>
    %251 = arith.mulf %247, %241 : vector<8x128xf32>
    %252 = arith.mulf %250, %244 : vector<8x128xf32>
    %253 = arith.subf %251, %252 : vector<8x128xf32>
    %254 = arith.addf %234, %253 : vector<8x128xf32>
    %255 = arith.mulf %247, %244 : vector<8x128xf32>
    %256 = arith.mulf %250, %241 : vector<8x128xf32>
    %257 = arith.addf %255, %256 : vector<8x128xf32>
    %258 = arith.addf %238, %257 : vector<8x128xf32>
    %c2_i32_213 = arith.constant 2 : i32
    %c0_214 = arith.constant 0 : index
    %259 = arith.index_cast %c2_i32_213 : i32 to index
    %c0_215 = arith.constant 0 : index
    %c0_216 = arith.constant 0 : index
    %260 = vector.load %arg3[%c0_214, %259, %c0_215, %c0_216] : memref<2x5x8x128xf32, #tpu.memory_space<vmem>>, vector<1x1x8x128xf32>
    %261 = vector.shape_cast %260 : vector<1x1x8x128xf32> to vector<8x128xf32>
    %c1_217 = arith.constant 1 : index
    %262 = arith.index_cast %c2_i32_213 : i32 to index
    %c0_218 = arith.constant 0 : index
    %c0_219 = arith.constant 0 : index
    %263 = vector.load %arg3[%c1_217, %262, %c0_218, %c0_219] : memref<2x5x8x128xf32, #tpu.memory_space<vmem>>, vector<1x1x8x128xf32>
    %264 = vector.shape_cast %263 : vector<1x1x8x128xf32> to vector<8x128xf32>
    %c0_220 = arith.constant 0 : index
    %c0_221 = arith.constant 0 : index
    %c2_222 = arith.constant 2 : index
    %265 = arith.index_cast %c2_i32_213 : i32 to index
    %c0_223 = arith.constant 0 : index
    %c0_224 = arith.constant 0 : index
    %266 = vector.load %arg2[%c0_220, %c0_221, %c2_222, %265, %c0_223, %c0_224] : memref<1x2x4x5x8x128xf32, #tpu.memory_space<vmem>>, vector<1x1x1x1x8x128xf32>
    %267 = vector.shape_cast %266 : vector<1x1x1x1x8x128xf32> to vector<8x128xf32>
    %c0_225 = arith.constant 0 : index
    %c1_226 = arith.constant 1 : index
    %c2_227 = arith.constant 2 : index
    %268 = arith.index_cast %c2_i32_213 : i32 to index
    %c0_228 = arith.constant 0 : index
    %c0_229 = arith.constant 0 : index
    %269 = vector.load %arg2[%c0_225, %c1_226, %c2_227, %268, %c0_228, %c0_229] : memref<1x2x4x5x8x128xf32, #tpu.memory_space<vmem>>, vector<1x1x1x1x8x128xf32>
    %270 = vector.shape_cast %269 : vector<1x1x1x1x8x128xf32> to vector<8x128xf32>
    %271 = arith.mulf %267, %261 : vector<8x128xf32>
    %272 = arith.mulf %270, %264 : vector<8x128xf32>
    %273 = arith.subf %271, %272 : vector<8x128xf32>
    %274 = arith.addf %254, %273 : vector<8x128xf32>
    %275 = arith.mulf %267, %264 : vector<8x128xf32>
    %276 = arith.mulf %270, %261 : vector<8x128xf32>
    %277 = arith.addf %275, %276 : vector<8x128xf32>
    %278 = arith.addf %258, %277 : vector<8x128xf32>
    %c3_i32_230 = arith.constant 3 : i32
    %c0_231 = arith.constant 0 : index
    %279 = arith.index_cast %c3_i32_230 : i32 to index
    %c0_232 = arith.constant 0 : index
    %c0_233 = arith.constant 0 : index
    %280 = vector.load %arg3[%c0_231, %279, %c0_232, %c0_233] : memref<2x5x8x128xf32, #tpu.memory_space<vmem>>, vector<1x1x8x128xf32>
    %281 = vector.shape_cast %280 : vector<1x1x8x128xf32> to vector<8x128xf32>
    %c1_234 = arith.constant 1 : index
    %282 = arith.index_cast %c3_i32_230 : i32 to index
    %c0_235 = arith.constant 0 : index
    %c0_236 = arith.constant 0 : index
    %283 = vector.load %arg3[%c1_234, %282, %c0_235, %c0_236] : memref<2x5x8x128xf32, #tpu.memory_space<vmem>>, vector<1x1x8x128xf32>
    %284 = vector.shape_cast %283 : vector<1x1x8x128xf32> to vector<8x128xf32>
    %c0_237 = arith.constant 0 : index
    %c0_238 = arith.constant 0 : index
    %c2_239 = arith.constant 2 : index
    %285 = arith.index_cast %c3_i32_230 : i32 to index
    %c0_240 = arith.constant 0 : index
    %c0_241 = arith.constant 0 : index
    %286 = vector.load %arg2[%c0_237, %c0_238, %c2_239, %285, %c0_240, %c0_241] : memref<1x2x4x5x8x128xf32, #tpu.memory_space<vmem>>, vector<1x1x1x1x8x128xf32>
    %287 = vector.shape_cast %286 : vector<1x1x1x1x8x128xf32> to vector<8x128xf32>
    %c0_242 = arith.constant 0 : index
    %c1_243 = arith.constant 1 : index
    %c2_244 = arith.constant 2 : index
    %288 = arith.index_cast %c3_i32_230 : i32 to index
    %c0_245 = arith.constant 0 : index
    %c0_246 = arith.constant 0 : index
    %289 = vector.load %arg2[%c0_242, %c1_243, %c2_244, %288, %c0_245, %c0_246] : memref<1x2x4x5x8x128xf32, #tpu.memory_space<vmem>>, vector<1x1x1x1x8x128xf32>
    %290 = vector.shape_cast %289 : vector<1x1x1x1x8x128xf32> to vector<8x128xf32>
    %291 = arith.mulf %287, %281 : vector<8x128xf32>
    %292 = arith.mulf %290, %284 : vector<8x128xf32>
    %293 = arith.subf %291, %292 : vector<8x128xf32>
    %294 = arith.addf %274, %293 : vector<8x128xf32>
    %295 = arith.mulf %287, %284 : vector<8x128xf32>
    %296 = arith.mulf %290, %281 : vector<8x128xf32>
    %297 = arith.addf %295, %296 : vector<8x128xf32>
    %298 = arith.addf %278, %297 : vector<8x128xf32>
    %c4_i32_247 = arith.constant 4 : i32
    %c0_248 = arith.constant 0 : index
    %299 = arith.index_cast %c4_i32_247 : i32 to index
    %c0_249 = arith.constant 0 : index
    %c0_250 = arith.constant 0 : index
    %300 = vector.load %arg3[%c0_248, %299, %c0_249, %c0_250] : memref<2x5x8x128xf32, #tpu.memory_space<vmem>>, vector<1x1x8x128xf32>
    %301 = vector.shape_cast %300 : vector<1x1x8x128xf32> to vector<8x128xf32>
    %c1_251 = arith.constant 1 : index
    %302 = arith.index_cast %c4_i32_247 : i32 to index
    %c0_252 = arith.constant 0 : index
    %c0_253 = arith.constant 0 : index
    %303 = vector.load %arg3[%c1_251, %302, %c0_252, %c0_253] : memref<2x5x8x128xf32, #tpu.memory_space<vmem>>, vector<1x1x8x128xf32>
    %304 = vector.shape_cast %303 : vector<1x1x8x128xf32> to vector<8x128xf32>
    %c0_254 = arith.constant 0 : index
    %c0_255 = arith.constant 0 : index
    %c2_256 = arith.constant 2 : index
    %305 = arith.index_cast %c4_i32_247 : i32 to index
    %c0_257 = arith.constant 0 : index
    %c0_258 = arith.constant 0 : index
    %306 = vector.load %arg2[%c0_254, %c0_255, %c2_256, %305, %c0_257, %c0_258] : memref<1x2x4x5x8x128xf32, #tpu.memory_space<vmem>>, vector<1x1x1x1x8x128xf32>
    %307 = vector.shape_cast %306 : vector<1x1x1x1x8x128xf32> to vector<8x128xf32>
    %c0_259 = arith.constant 0 : index
    %c1_260 = arith.constant 1 : index
    %c2_261 = arith.constant 2 : index
    %308 = arith.index_cast %c4_i32_247 : i32 to index
    %c0_262 = arith.constant 0 : index
    %c0_263 = arith.constant 0 : index
    %309 = vector.load %arg2[%c0_259, %c1_260, %c2_261, %308, %c0_262, %c0_263] : memref<1x2x4x5x8x128xf32, #tpu.memory_space<vmem>>, vector<1x1x1x1x8x128xf32>
    %310 = vector.shape_cast %309 : vector<1x1x1x1x8x128xf32> to vector<8x128xf32>
    %311 = arith.mulf %307, %301 : vector<8x128xf32>
    %312 = arith.mulf %310, %304 : vector<8x128xf32>
    %313 = arith.subf %311, %312 : vector<8x128xf32>
    %314 = arith.addf %294, %313 : vector<8x128xf32>
    %315 = arith.mulf %307, %304 : vector<8x128xf32>
    %316 = arith.mulf %310, %301 : vector<8x128xf32>
    %317 = arith.addf %315, %316 : vector<8x128xf32>
    %318 = arith.addf %298, %317 : vector<8x128xf32>
    %c5_i32_264 = arith.constant 5 : i32
    %cst_265 = arith.constant dense<0.000000e+00> : vector<128xf32>
    %319 = vector.multi_reduction <add>, %314, %cst_265 [0] : vector<8x128xf32> to vector<128xf32>
    %c0_266 = arith.constant 0 : index
    %c2_267 = arith.constant 2 : index
    %c0_268 = arith.constant 0 : index
    %320 = vector.load %arg4[%c0_266, %c2_267, %c0_268] : memref<1x8x128xf32, #tpu.memory_space<vmem>>, vector<1x1x128xf32>
    %321 = vector.shape_cast %320 : vector<1x1x128xf32> to vector<128xf32>
    %322 = vector.shape_cast %319 : vector<128xf32> to vector<1x1x128xf32>
    tpu.vector_store %arg4[%c0_266, %c2_267, %c0_268], %322 {strides = array<i32>} : memref<1x8x128xf32, #tpu.memory_space<vmem>>, vector<1x1x128xf32>,
    %cst_269 = arith.constant dense<0.000000e+00> : vector<128xf32>
    %323 = vector.multi_reduction <add>, %318, %cst_269 [0] : vector<8x128xf32> to vector<128xf32>
    %c0_270 = arith.constant 0 : index
    %c6 = arith.constant 6 : index
    %c0_271 = arith.constant 0 : index
    %324 = vector.load %arg4[%c0_270, %c6, %c0_271] : memref<1x8x128xf32, #tpu.memory_space<vmem>>, vector<1x1x128xf32>
    %325 = vector.shape_cast %324 : vector<1x1x128xf32> to vector<128xf32>
    %326 = vector.shape_cast %323 : vector<128xf32> to vector<1x1x128xf32>
    tpu.vector_store %arg4[%c0_270, %c6, %c0_271], %326 {strides = array<i32>} : memref<1x8x128xf32, #tpu.memory_space<vmem>>, vector<1x1x128xf32>,
    %cst_272 = arith.constant 0.000000e+00 : f32
    %327 = vector.broadcast %cst_272 : f32 to vector<8x128xf32>
    %c0_i32_273 = arith.constant 0 : i32
    %c0_274 = arith.constant 0 : index
    %328 = arith.index_cast %c0_i32_273 : i32 to index
    %c0_275 = arith.constant 0 : index
    %c0_276 = arith.constant 0 : index
    %329 = vector.load %arg3[%c0_274, %328, %c0_275, %c0_276] : memref<2x5x8x128xf32, #tpu.memory_space<vmem>>, vector<1x1x8x128xf32>
    %330 = vector.shape_cast %329 : vector<1x1x8x128xf32> to vector<8x128xf32>
    %c1_277 = arith.constant 1 : index
    %331 = arith.index_cast %c0_i32_273 : i32 to index
    %c0_278 = arith.constant 0 : index
    %c0_279 = arith.constant 0 : index
    %332 = vector.load %arg3[%c1_277, %331, %c0_278, %c0_279] : memref<2x5x8x128xf32, #tpu.memory_space<vmem>>, vector<1x1x8x128xf32>
    %333 = vector.shape_cast %332 : vector<1x1x8x128xf32> to vector<8x128xf32>
    %c0_280 = arith.constant 0 : index
    %c0_281 = arith.constant 0 : index
    %c3 = arith.constant 3 : index
    %334 = arith.index_cast %c0_i32_273 : i32 to index
    %c0_282 = arith.constant 0 : index
    %c0_283 = arith.constant 0 : index
    %335 = vector.load %arg2[%c0_280, %c0_281, %c3, %334, %c0_282, %c0_283] : memref<1x2x4x5x8x128xf32, #tpu.memory_space<vmem>>, vector<1x1x1x1x8x128xf32>
    %336 = vector.shape_cast %335 : vector<1x1x1x1x8x128xf32> to vector<8x128xf32>
    %c0_284 = arith.constant 0 : index
    %c1_285 = arith.constant 1 : index
    %c3_286 = arith.constant 3 : index
    %337 = arith.index_cast %c0_i32_273 : i32 to index
    %c0_287 = arith.constant 0 : index
    %c0_288 = arith.constant 0 : index
    %338 = vector.load %arg2[%c0_284, %c1_285, %c3_286, %337, %c0_287, %c0_288] : memref<1x2x4x5x8x128xf32, #tpu.memory_space<vmem>>, vector<1x1x1x1x8x128xf32>
    %339 = vector.shape_cast %338 : vector<1x1x1x1x8x128xf32> to vector<8x128xf32>
    %340 = arith.mulf %336, %330 : vector<8x128xf32>
    %341 = arith.mulf %339, %333 : vector<8x128xf32>
    %342 = arith.subf %340, %341 : vector<8x128xf32>
    %343 = arith.addf %327, %342 : vector<8x128xf32>
    %344 = arith.mulf %336, %333 : vector<8x128xf32>
    %345 = arith.mulf %339, %330 : vector<8x128xf32>
    %346 = arith.addf %344, %345 : vector<8x128xf32>
    %347 = arith.addf %327, %346 : vector<8x128xf32>
    %c1_i32_289 = arith.constant 1 : i32
    %c0_290 = arith.constant 0 : index
    %348 = arith.index_cast %c1_i32_289 : i32 to index
    %c0_291 = arith.constant 0 : index
    %c0_292 = arith.constant 0 : index
    %349 = vector.load %arg3[%c0_290, %348, %c0_291, %c0_292] : memref<2x5x8x128xf32, #tpu.memory_space<vmem>>, vector<1x1x8x128xf32>
    %350 = vector.shape_cast %349 : vector<1x1x8x128xf32> to vector<8x128xf32>
    %c1_293 = arith.constant 1 : index
    %351 = arith.index_cast %c1_i32_289 : i32 to index
    %c0_294 = arith.constant 0 : index
    %c0_295 = arith.constant 0 : index
    %352 = vector.load %arg3[%c1_293, %351, %c0_294, %c0_295] : memref<2x5x8x128xf32, #tpu.memory_space<vmem>>, vector<1x1x8x128xf32>
    %353 = vector.shape_cast %352 : vector<1x1x8x128xf32> to vector<8x128xf32>
    %c0_296 = arith.constant 0 : index
    %c0_297 = arith.constant 0 : index
    %c3_298 = arith.constant 3 : index
    %354 = arith.index_cast %c1_i32_289 : i32 to index
    %c0_299 = arith.constant 0 : index
    %c0_300 = arith.constant 0 : index
    %355 = vector.load %arg2[%c0_296, %c0_297, %c3_298, %354, %c0_299, %c0_300] : memref<1x2x4x5x8x128xf32, #tpu.memory_space<vmem>>, vector<1x1x1x1x8x128xf32>
    %356 = vector.shape_cast %355 : vector<1x1x1x1x8x128xf32> to vector<8x128xf32>
    %c0_301 = arith.constant 0 : index
    %c1_302 = arith.constant 1 : index
    %c3_303 = arith.constant 3 : index
    %357 = arith.index_cast %c1_i32_289 : i32 to index
    %c0_304 = arith.constant 0 : index
    %c0_305 = arith.constant 0 : index
    %358 = vector.load %arg2[%c0_301, %c1_302, %c3_303, %357, %c0_304, %c0_305] : memref<1x2x4x5x8x128xf32, #tpu.memory_space<vmem>>, vector<1x1x1x1x8x128xf32>
    %359 = vector.shape_cast %358 : vector<1x1x1x1x8x128xf32> to vector<8x128xf32>
    %360 = arith.mulf %356, %350 : vector<8x128xf32>
    %361 = arith.mulf %359, %353 : vector<8x128xf32>
    %362 = arith.subf %360, %361 : vector<8x128xf32>
    %363 = arith.addf %343, %362 : vector<8x128xf32>
    %364 = arith.mulf %356, %353 : vector<8x128xf32>
    %365 = arith.mulf %359, %350 : vector<8x128xf32>
    %366 = arith.addf %364, %365 : vector<8x128xf32>
    %367 = arith.addf %347, %366 : vector<8x128xf32>
    %c2_i32_306 = arith.constant 2 : i32
    %c0_307 = arith.constant 0 : index
    %368 = arith.index_cast %c2_i32_306 : i32 to index
    %c0_308 = arith.constant 0 : index
    %c0_309 = arith.constant 0 : index
    %369 = vector.load %arg3[%c0_307, %368, %c0_308, %c0_309] : memref<2x5x8x128xf32, #tpu.memory_space<vmem>>, vector<1x1x8x128xf32>
    %370 = vector.shape_cast %369 : vector<1x1x8x128xf32> to vector<8x128xf32>
    %c1_310 = arith.constant 1 : index
    %371 = arith.index_cast %c2_i32_306 : i32 to index
    %c0_311 = arith.constant 0 : index
    %c0_312 = arith.constant 0 : index
    %372 = vector.load %arg3[%c1_310, %371, %c0_311, %c0_312] : memref<2x5x8x128xf32, #tpu.memory_space<vmem>>, vector<1x1x8x128xf32>
    %373 = vector.shape_cast %372 : vector<1x1x8x128xf32> to vector<8x128xf32>
    %c0_313 = arith.constant 0 : index
    %c0_314 = arith.constant 0 : index
    %c3_315 = arith.constant 3 : index
    %374 = arith.index_cast %c2_i32_306 : i32 to index
    %c0_316 = arith.constant 0 : index
    %c0_317 = arith.constant 0 : index
    %375 = vector.load %arg2[%c0_313, %c0_314, %c3_315, %374, %c0_316, %c0_317] : memref<1x2x4x5x8x128xf32, #tpu.memory_space<vmem>>, vector<1x1x1x1x8x128xf32>
    %376 = vector.shape_cast %375 : vector<1x1x1x1x8x128xf32> to vector<8x128xf32>
    %c0_318 = arith.constant 0 : index
    %c1_319 = arith.constant 1 : index
    %c3_320 = arith.constant 3 : index
    %377 = arith.index_cast %c2_i32_306 : i32 to index
    %c0_321 = arith.constant 0 : index
    %c0_322 = arith.constant 0 : index
    %378 = vector.load %arg2[%c0_318, %c1_319, %c3_320, %377, %c0_321, %c0_322] : memref<1x2x4x5x8x128xf32, #tpu.memory_space<vmem>>, vector<1x1x1x1x8x128xf32>
    %379 = vector.shape_cast %378 : vector<1x1x1x1x8x128xf32> to vector<8x128xf32>
    %380 = arith.mulf %376, %370 : vector<8x128xf32>
    %381 = arith.mulf %379, %373 : vector<8x128xf32>
    %382 = arith.subf %380, %381 : vector<8x128xf32>
    %383 = arith.addf %363, %382 : vector<8x128xf32>
    %384 = arith.mulf %376, %373 : vector<8x128xf32>
    %385 = arith.mulf %379, %370 : vector<8x128xf32>
    %386 = arith.addf %384, %385 : vector<8x128xf32>
    %387 = arith.addf %367, %386 : vector<8x128xf32>
    %c3_i32_323 = arith.constant 3 : i32
    %c0_324 = arith.constant 0 : index
    %388 = arith.index_cast %c3_i32_323 : i32 to index
    %c0_325 = arith.constant 0 : index
    %c0_326 = arith.constant 0 : index
    %389 = vector.load %arg3[%c0_324, %388, %c0_325, %c0_326] : memref<2x5x8x128xf32, #tpu.memory_space<vmem>>, vector<1x1x8x128xf32>
    %390 = vector.shape_cast %389 : vector<1x1x8x128xf32> to vector<8x128xf32>
    %c1_327 = arith.constant 1 : index
    %391 = arith.index_cast %c3_i32_323 : i32 to index
    %c0_328 = arith.constant 0 : index
    %c0_329 = arith.constant 0 : index
    %392 = vector.load %arg3[%c1_327, %391, %c0_328, %c0_329] : memref<2x5x8x128xf32, #tpu.memory_space<vmem>>, vector<1x1x8x128xf32>
    %393 = vector.shape_cast %392 : vector<1x1x8x128xf32> to vector<8x128xf32>
    %c0_330 = arith.constant 0 : index
    %c0_331 = arith.constant 0 : index
    %c3_332 = arith.constant 3 : index
    %394 = arith.index_cast %c3_i32_323 : i32 to index
    %c0_333 = arith.constant 0 : index
    %c0_334 = arith.constant 0 : index
    %395 = vector.load %arg2[%c0_330, %c0_331, %c3_332, %394, %c0_333, %c0_334] : memref<1x2x4x5x8x128xf32, #tpu.memory_space<vmem>>, vector<1x1x1x1x8x128xf32>
    %396 = vector.shape_cast %395 : vector<1x1x1x1x8x128xf32> to vector<8x128xf32>
    %c0_335 = arith.constant 0 : index
    %c1_336 = arith.constant 1 : index
    %c3_337 = arith.constant 3 : index
    %397 = arith.index_cast %c3_i32_323 : i32 to index
    %c0_338 = arith.constant 0 : index
    %c0_339 = arith.constant 0 : index
    %398 = vector.load %arg2[%c0_335, %c1_336, %c3_337, %397, %c0_338, %c0_339] : memref<1x2x4x5x8x128xf32, #tpu.memory_space<vmem>>, vector<1x1x1x1x8x128xf32>
    %399 = vector.shape_cast %398 : vector<1x1x1x1x8x128xf32> to vector<8x128xf32>
    %400 = arith.mulf %396, %390 : vector<8x128xf32>
    %401 = arith.mulf %399, %393 : vector<8x128xf32>
    %402 = arith.subf %400, %401 : vector<8x128xf32>
    %403 = arith.addf %383, %402 : vector<8x128xf32>
    %404 = arith.mulf %396, %393 : vector<8x128xf32>
    %405 = arith.mulf %399, %390 : vector<8x128xf32>
    %406 = arith.addf %404, %405 : vector<8x128xf32>
    %407 = arith.addf %387, %406 : vector<8x128xf32>
    %c4_i32_340 = arith.constant 4 : i32
    %c0_341 = arith.constant 0 : index
    %408 = arith.index_cast %c4_i32_340 : i32 to index
    %c0_342 = arith.constant 0 : index
    %c0_343 = arith.constant 0 : index
    %409 = vector.load %arg3[%c0_341, %408, %c0_342, %c0_343] : memref<2x5x8x128xf32, #tpu.memory_space<vmem>>, vector<1x1x8x128xf32>
    %410 = vector.shape_cast %409 : vector<1x1x8x128xf32> to vector<8x128xf32>
    %c1_344 = arith.constant 1 : index
    %411 = arith.index_cast %c4_i32_340 : i32 to index
    %c0_345 = arith.constant 0 : index
    %c0_346 = arith.constant 0 : index
    %412 = vector.load %arg3[%c1_344, %411, %c0_345, %c0_346] : memref<2x5x8x128xf32, #tpu.memory_space<vmem>>, vector<1x1x8x128xf32>
    %413 = vector.shape_cast %412 : vector<1x1x8x128xf32> to vector<8x128xf32>
    %c0_347 = arith.constant 0 : index
    %c0_348 = arith.constant 0 : index
    %c3_349 = arith.constant 3 : index
    %414 = arith.index_cast %c4_i32_340 : i32 to index
    %c0_350 = arith.constant 0 : index
    %c0_351 = arith.constant 0 : index
    %415 = vector.load %arg2[%c0_347, %c0_348, %c3_349, %414, %c0_350, %c0_351] : memref<1x2x4x5x8x128xf32, #tpu.memory_space<vmem>>, vector<1x1x1x1x8x128xf32>
    %416 = vector.shape_cast %415 : vector<1x1x1x1x8x128xf32> to vector<8x128xf32>
    %c0_352 = arith.constant 0 : index
    %c1_353 = arith.constant 1 : index
    %c3_354 = arith.constant 3 : index
    %417 = arith.index_cast %c4_i32_340 : i32 to index
    %c0_355 = arith.constant 0 : index
    %c0_356 = arith.constant 0 : index
    %418 = vector.load %arg2[%c0_352, %c1_353, %c3_354, %417, %c0_355, %c0_356] : memref<1x2x4x5x8x128xf32, #tpu.memory_space<vmem>>, vector<1x1x1x1x8x128xf32>
    %419 = vector.shape_cast %418 : vector<1x1x1x1x8x128xf32> to vector<8x128xf32>
    %420 = arith.mulf %416, %410 : vector<8x128xf32>
    %421 = arith.mulf %419, %413 : vector<8x128xf32>
    %422 = arith.subf %420, %421 : vector<8x128xf32>
    %423 = arith.addf %403, %422 : vector<8x128xf32>
    %424 = arith.mulf %416, %413 : vector<8x128xf32>
    %425 = arith.mulf %419, %410 : vector<8x128xf32>
    %426 = arith.addf %424, %425 : vector<8x128xf32>
    %427 = arith.addf %407, %426 : vector<8x128xf32>
    %c5_i32_357 = arith.constant 5 : i32
    %cst_358 = arith.constant dense<0.000000e+00> : vector<128xf32>
    %428 = vector.multi_reduction <add>, %423, %cst_358 [0] : vector<8x128xf32> to vector<128xf32>
    %c0_359 = arith.constant 0 : index
    %c3_360 = arith.constant 3 : index
    %c0_361 = arith.constant 0 : index
    %429 = vector.load %arg4[%c0_359, %c3_360, %c0_361] : memref<1x8x128xf32, #tpu.memory_space<vmem>>, vector<1x1x128xf32>
    %430 = vector.shape_cast %429 : vector<1x1x128xf32> to vector<128xf32>
    %431 = vector.shape_cast %428 : vector<128xf32> to vector<1x1x128xf32>
    tpu.vector_store %arg4[%c0_359, %c3_360, %c0_361], %431 {strides = array<i32>} : memref<1x8x128xf32, #tpu.memory_space<vmem>>, vector<1x1x128xf32>,
    %cst_362 = arith.constant dense<0.000000e+00> : vector<128xf32>
    %432 = vector.multi_reduction <add>, %427, %cst_362 [0] : vector<8x128xf32> to vector<128xf32>
    %c0_363 = arith.constant 0 : index
    %c7 = arith.constant 7 : index
    %c0_364 = arith.constant 0 : index
    %433 = vector.load %arg4[%c0_363, %c7, %c0_364] : memref<1x8x128xf32, #tpu.memory_space<vmem>>, vector<1x1x128xf32>
    %434 = vector.shape_cast %433 : vector<1x1x128xf32> to vector<128xf32>
    %435 = vector.shape_cast %432 : vector<128xf32> to vector<1x1x128xf32>
    tpu.vector_store %arg4[%c0_363, %c7, %c0_364], %435 {strides = array<i32>} : memref<1x8x128xf32, #tpu.memory_space<vmem>>, vector<1x1x128xf32>,
    return
  }
  func.func @transform_0(%arg0: i32, %arg1: i32) -> (i32, i32, i32, i32, i32, i32) {
    %c0_i32 = arith.constant 0 : i32
    %c0_i32_0 = arith.constant 0 : i32
    %c0_i32_1 = arith.constant 0 : i32
    %c0_i32_2 = arith.constant 0 : i32
    %c0_i32_3 = arith.constant 0 : i32
    return %arg1, %c0_i32, %c0_i32_0, %c0_i32_1, %c0_i32_2, %arg0 : i32, i32, i32, i32, i32, i32
  }
  func.func @transform_1(%arg0: i32, %arg1: i32) -> (i32, i32, i32, i32) {
    %c0_i32 = arith.constant 0 : i32
    %c0_i32_0 = arith.constant 0 : i32
    %c0_i32_1 = arith.constant 0 : i32
    %c0_i32_2 = arith.constant 0 : i32
    return %c0_i32, %c0_i32_0, %c0_i32_1, %arg0 : i32, i32, i32, i32
  }
  func.func @transform_2(%arg0: i32, %arg1: i32) -> (i32, i32, i32) {
    %c0_i32 = arith.constant 0 : i32
    %c0_i32_0 = arith.constant 0 : i32
    return %arg1, %c0_i32, %arg0 : i32, i32, i32
  }
}

</mosaic_0001>

<bundles_post_ra>
// kernel: custom-call
= control target key start
LH: loop header
LB: loop body
LE: loop exit
PB: predicated region body
PF: predicated region fallthrough
CT: control target
= control target key end

     0   :  { %2 = vsyncpa [#allocation0], 0  ;;  %s47_s0 = inlined_call_operand.hbm [shape: c64[2,4,4,4,4,4], index: 0, kind: input, shape index: {}]   ;;  %s48_s1 = inlined_call_operand.vmem [shape: f32[2,4,4,4,4,4], index: 1, kind: output, shape index: {}]  }
   0x1   :  { %s3_s8 = sshll.u32 %s48_s1, 4  ;;  %s4_s8 = int_to_ptr.vmem [resolvable:$true] %s3_s8 }
   0x2   :  { %s17_s9 = scalar_lea.vmem %s4_s8, 8192  ;;  %p22_p1 = scmp.lt.s32.totalorder %s4_s8, %s4_s8 }
   0x3   :  { %p18_p0 = scmp.ne.s32.totalorder %s4_s8, %s17_s9  ;;  %p23_p2 = scmp.lt.s32.totalorder %s17_s9, %s17_s9 }
   0x5   :  { %p24_p3 = por %p23_p2, %p22_p1 }
   0x7   :  { %p25_p4 = pnand %p24_p3, %p18_p0 }
   0x9   :  { %28 = shalt.err (!%p25_p4)  }
   0xa   :  { %6 = dma.hbm_to_vmem [thread:$0]  %s47_s0, 8192, %s4_s8, [#allocation0] }
   0xb   :  { %29 = dma.done.wait [#allocation0], 8192  }
   0xc   :  { %30 = vsyncadd [#allocation0], 4294959104 }
   0xd   :  { %8 = vsyncpa [#allocation0], 1 }

// kernel: custom-call.1
= control target key start
LH: loop header
LB: loop body
LE: loop exit
PB: predicated region body
PF: predicated region fallthrough
CT: control target
= control target key end

     0   :  { %s51_s0 = inlined_call_operand.hbm [shape: c64[2,4,4,4,4,4], index: 0, kind: input, shape index: {}]   ;;  %s52_s1 = inlined_call_operand.vmem [shape: f32[2,4,4,4,4,4], index: 1, kind: output, shape index: {}]  }
   0x1   :  { %s2_s8 = scalar_lea.hbm %s51_s0, 8192 }
   0x2   :  { %3 = vsyncpa [#allocation0], 0  ;;  %s4_s11 = sshll.u32 %s52_s1, 4  ;;  %s5_s11 = int_to_ptr.vmem [resolvable:$true] %s4_s11 }
   0x3   :  { %s20_s12 = scalar_lea.vmem %s5_s11, 8192  ;;  %p25_p1 = scmp.lt.s32.totalorder %s5_s11, %s5_s11 }
   0x4   :  { %p21_p0 = scmp.ne.s32.totalorder %s5_s11, %s20_s12  ;;  %p26_p2 = scmp.lt.s32.totalorder %s20_s12, %s20_s12 }
   0x6   :  { %p27_p3 = por %p26_p2, %p25_p1 }
   0x8   :  { %p28_p4 = pnand %p27_p3, %p21_p0 }
   0xa   :  { %31 = shalt.err (!%p28_p4)  }
   0xb   :  { %7 = dma.hbm_to_vmem [thread:$0]  %s2_s8, 8192, %s5_s11, [#allocation0] }
   0xc   :  { %33 = dma.done.wait [#allocation0], 8192  }
   0xd   :  { %34 = vsyncadd [#allocation0], 4294959104 }
   0xe   :  { %9 = vsyncpa [#allocation0], 1 }

// kernel: custom-call.2
= control target key start
LH: loop header
LB: loop body
LE: loop exit
PB: predicated region body
PF: predicated region fallthrough
CT: control target
= control target key end

     0   :  { %s92_s0 = inlined_call_operand.vmem [shape: f32[3,4,4,4,4,4], index: 0, kind: input, shape index: {}]   ;;  %s93_s1 = inlined_call_operand.vmem [shape: f32[3,4,4,4,4,4], index: 1, kind: input, shape index: {}]   ;;  %s94_s2 = inlined_call_operand.hbm [shape: c64[3,4,4,4,4,4], index: 2, kind: output, shape index: {}]  }
   0x1   :  { %s3_s11 = scalar_lea.hbm %s94_s2, 12288 }
   0x2   :  { %4 = vsyncpa [#allocation0], 0  ;;  %s5_s14 = sshll.u32 %s92_s0, 4  ;;  %s6_s14 = int_to_ptr.vmem [resolvable:$true] %s5_s14 }
   0x3   :  { %s18_s15 = scalar_lea.vmem %s6_s14, 12288  ;;  %p23_p1 = scmp.lt.s32.totalorder %s6_s14, %s6_s14 }
   0x4   :  { %p19_p0 = scmp.ne.s32.totalorder %s6_s14, %s18_s15  ;;  %p24_p2 = scmp.lt.s32.totalorder %s18_s15, %s18_s15 }
   0x6   :  { %p25_p3 = por %p24_p2, %p23_p1 }
   0x8   :  { %p26_p4 = pnand %p25_p3, %p19_p0 }
   0xa   :  { %29 = shalt.err (!%p26_p4)  }
   0xb   :  { %8 = dma.vmem_to_hbm [thread:$0]  %s6_s14, 12288, %s94_s2, [#allocation0] }
   0xc   :  { %61 = dma.done.wait [#allocation0], 12288  }
   0xd   :  { %62 = vsyncadd [#allocation0], 4294955008 }
   0xe   :  { %10 = vsyncpa [#allocation0], 1 }
   0xf   :  { %11 = vsyncpa [#allocation1], 0  ;;  %s12_s0 = sshll.u32 %s93_s1, 4  ;;  %s13_s0 = int_to_ptr.vmem [resolvable:$true] %s12_s0 }
  0x10   :  { %s38_s20 = scalar_lea.vmem %s13_s0, 12288  ;;  %p43_p6 = scmp.lt.s32.totalorder %s13_s0, %s13_s0 }
  0x11   :  { %p39_p5 = scmp.ne.s32.totalorder %s13_s0, %s38_s20  ;;  %p44_p7 = scmp.lt.s32.totalorder %s38_s20, %s38_s20 }
  0x13   :  { %p45_p8 = por %p44_p7, %p43_p6 }
  0x15   :  { %p46_p9 = pnand %p45_p8, %p39_p5 }
  0x17   :  { %49 = shalt.err (!%p46_p9)  }
  0x18   :  { %15 = dma.vmem_to_hbm [thread:$0]  %s13_s0, 12288, %s3_s11, [#allocation1] }
  0x19   :  { %63 = dma.done.wait [#allocation1], 12288  }
  0x1a   :  { %64 = vsyncadd [#allocation1], 4294955008 }
  0x1b   :  { %17 = vsyncpa [#allocation1], 1 }

// kernel: _lambda_.1
= control target key start
LH: loop header
LB: loop body
LE: loop exit
PB: predicated region body
PF: predicated region fallthrough
CT: control target
= control target key end

     0   :  { %s1150_s9 = smov 0   ;;  %s1152_s10 = smov 0   ;;  %s1527_s0 = inlined_call_operand.vmem [shape: f32[3,2,4,5,8,256], index: 0, kind: input, shape index: {}]   ;;  %s1528_s1 = inlined_call_operand.vmem [shape: f32[2,5,8,256], index: 1, kind: input, shape index: {}]   ;;  %s1529_s2 = inlined_call_operand.vmem [shape: f32[3,8,256], index: 2, kind: output, shape index: {}]  }
   0x1   :  { %s1154_s11 = smov 0   ;;  %s1156_s12 = smov 0  }
   0x2   :  { %s1158_s13 = smov 0   ;;  %s1160_s14 = smov 0  }
   0x3   :  { %s1162_s15 = smov 0   ;;  %s1164_s16 = smov 0  }
   0x4   :  { %s1166_s17 = smov 0  }
   0x5 LB: > { %s21_s18 = sadd.s32 1, %s1125_s15  ;;  %s24_s19 = sadd.s32 1, %s1129_s16  ;;  %s1133_s17 = sphi %s1166_s17, %s12_s17   ;;  %s1129_s16 = sphi %s1164_s16, %s1539_s16   ;;  %s1125_s15 = sphi %s1162_s15, %s1538_s15   ;;  %s1121_s14 = sphi %s1160_s14, %s1537_s14   ;;  %s1117_s13 = sphi %s1158_s13, %s1536_s13   ;;  %s1113_s12 = sphi %s1156_s12, %s1535_s12   ;;  %s1109_s11 = sphi %s1154_s11, %s1534_s11   ;;  %s1105_s10 = sphi %s1152_s10, %s1533_s10   ;;  %s1101_s9 = sphi %s1150_s9, %s1532_s9  }
   0x6   : > { %p22_p0 = scmp.ge.s32.totalorder %s21_s18, 3  ;;  %p40_p1 = scmp.ne.s32.totalorder %s1113_s12, %s1109_s11 }
   0x7   : > { %p41_p2 = scmp.eq.s32.totalorder %s1133_s17, 0  ;;  %p66_p5 = scmp.ne.s32.totalorder %s1105_s10, %s1101_s9 }
   0x8   : > { %s1541_s18 = smov (%p22_p0, %s21_s18), 0  ;;  %s1543_s19 = smov (!%p22_p0, %s24_s19), %s1129_s16 }
   0x9   : > { %p1203_p3 = por %p41_p2, %p40_p1  ;;  %p26_p4 = scmp.ge.s32.totalorder %s1543_s19, 2 }
   0xa   : > { %s28_s21 = ssub.s32 %s1125_s15, %s1541_s18  ;;  %s33_s22 = sadd.s32 1, %s1113_s12 }
   0xb   : > { %s1545_s19 = smov (%p26_p4, %s1543_s19), 0  ;;  %p1214_p6 = por %p66_p5, %p41_p2 }
   0xc   : > { %s29_s24 = ssub.s32 %s1129_s16, %s1545_s19  ;;  %s59_s25 = sadd.s32 1, %s1105_s10 }
   0xd   : > { %s30_s26 = sor.u32 %s29_s24, %s28_s21  ;;  %p57_p7 = scmp.eq.s32.totalorder %s29_s24, 0 }
   0xe   : > { %p31_p8 = scmp.eq.s32.totalorder %s30_s26, 0  ;;  %p903_p9 = scmp.ge.s32.totalorder %s1133_s17, 6 }
   0xf   : > { %s1222_s27 = scalar_select %p57_p7, %s1105_s10, %s59_s25  }
  0x10   : > { %s1225_s28 = scalar_select %p31_p8, %s1113_s12, %s33_s22  }
  0x11   : > { %120 = sbr.rel (%p903_p9) target bundleno = 58 (0x3a), region = 16 }
  0x16   : > { %123 = sbr.rel (!%p1203_p3) target bundleno = 49 (0x31), region = 20  ;;  %s125_s29 = sand.u32 (%p1203_p3), 1, %s1113_s12  }
  0x17   : > { %s987_s30 = smul.u32 (%p1203_p3), 80, %s1125_s15 }
  0x18   : > { %s986_s3 = smul.u32 (%p1203_p3), 320, %s125_s29 }
  0x19   : > { %s129_s4 = sadd.s32 (%p1203_p3), %s1129_s16, %s987_s30 }
  0x1a   : > { %s904_s5 = sshll.u32 (%p1203_p3), %s129_s4, 3  ;;  %s1241_s20 = scalar_lea.vmem (%p1203_p3), [#allocation2], %s986_s3 }
  0x1b   : > { %s1236_s8 = scalar_lea.vmem %s1527_s0, %s904_s5 }
  0x1c   : > { %v238_v0 = vld [vmem:[%s1236_s8] sm:$0xff]  ;;  %v240_v1 = vld [vmem:[%s1236_s8 + $0x10] sm:$0xff] }
  0x1d   : > { %v242_v2 = vld [vmem:[%s1236_s8 + $0x20] sm:$0xff]  ;;  %239 = vst [vmem:[%s1241_s20] sm:$0xff] %v238_v0  ;;  %241 = vst [vmem:[%s1241_s20 + $0x8] sm:$0xff] %v240_v1  ;;  %v244_v3 = vld [vmem:[%s1236_s8 + $0x30] sm:$0xff] }
  0x1e   : > { %243 = vst [vmem:[%s1241_s20 + $0x10] sm:$0xff] %v242_v2  ;;  %v246_v4 = vld [vmem:[%s1236_s8 + $0x40] sm:$0xff]  ;;  %v248_v5 = vld [vmem:[%s1236_s8 + $0x50] sm:$0xff]  ;;  %245 = vst [vmem:[%s1241_s20 + $0x18] sm:$0xff] %v244_v3 }
  0x1f   : > { %247 = vst [vmem:[%s1241_s20 + $0x20] sm:$0xff] %v246_v4  ;;  %249 = vst [vmem:[%s1241_s20 + $0x28] sm:$0xff] %v248_v5  ;;  %v250_v6 = vld [vmem:[%s1236_s8 + $0x60] sm:$0xff]  ;;  %v252_v7 = vld [vmem:[%s1236_s8 + $0x70] sm:$0xff] }
  0x20   : > { %v254_v8 = vld [vmem:[%s1236_s8 + $0x80] sm:$0xff]  ;;  %251 = vst [vmem:[%s1241_s20 + $0x30] sm:$0xff] %v250_v6  ;;  %253 = vst [vmem:[%s1241_s20 + $0x38] sm:$0xff] %v252_v7  ;;  %v256_v9 = vld [vmem:[%s1236_s8 + $0x90] sm:$0xff] }
  0x21   : > { %255 = vst [vmem:[%s1241_s20 + $0x40] sm:$0xff] %v254_v8  ;;  %v258_v10 = vld [vmem:[%s1236_s8 + $0xa0] sm:$0xff]  ;;  %v260_v11 = vld [vmem:[%s1236_s8 + $0xb0] sm:$0xff]  ;;  %257 = vst [vmem:[%s1241_s20 + $0x48] sm:$0xff] %v256_v9 }
  0x22   : > { %259 = vst [vmem:[%s1241_s20 + $0x50] sm:$0xff] %v258_v10  ;;  %261 = vst [vmem:[%s1241_s20 + $0x58] sm:$0xff] %v260_v11  ;;  %v262_v12 = vld [vmem:[%s1236_s8 + $0xc0] sm:$0xff]  ;;  %v264_v13 = vld [vmem:[%s1236_s8 + $0xd0] sm:$0xff] }
  0x23   : > { %v266_v14 = vld [vmem:[%s1236_s8 + $0xe0] sm:$0xff]  ;;  %263 = vst [vmem:[%s1241_s20 + $0x60] sm:$0xff] %v262_v12  ;;  %265 = vst [vmem:[%s1241_s20 + $0x68] sm:$0xff] %v264_v13  ;;  %v268_v15 = vld [vmem:[%s1236_s8 + $0xf0] sm:$0xff] }
  0x24   : > { %267 = vst [vmem:[%s1241_s20 + $0x70] sm:$0xff] %v266_v14  ;;  %v270_v16 = vld [vmem:[%s1236_s8 + $0x100] sm:$0xff]  ;;  %v272_v17 = vld [vmem:[%s1236_s8 + $0x110] sm:$0xff]  ;;  %269 = vst [vmem:[%s1241_s20 + $0x78] sm:$0xff] %v268_v15 }
  0x25   : > { %271 = vst [vmem:[%s1241_s20 + $0x80] sm:$0xff] %v270_v16  ;;  %273 = vst [vmem:[%s1241_s20 + $0x88] sm:$0xff] %v272_v17  ;;  %v274_v18 = vld [vmem:[%s1236_s8 + $0x120] sm:$0xff]  ;;  %v276_v19 = vld [vmem:[%s1236_s8 + $0x130] sm:$0xff] }
  0x26   : > { %v278_v20 = vld [vmem:[%s1236_s8 + $0x140] sm:$0xff]  ;;  %275 = vst [vmem:[%s1241_s20 + $0x90] sm:$0xff] %v274_v18  ;;  %277 = vst [vmem:[%s1241_s20 + $0x98] sm:$0xff] %v276_v19  ;;  %v280_v21 = vld [vmem:[%s1236_s8 + $0x150] sm:$0xff] }
  0x27   : > { %279 = vst [vmem:[%s1241_s20 + $0xa0] sm:$0xff] %v278_v20  ;;  %v282_v22 = vld [vmem:[%s1236_s8 + $0x160] sm:$0xff]  ;;  %v284_v23 = vld [vmem:[%s1236_s8 + $0x170] sm:$0xff]  ;;  %281 = vst [vmem:[%s1241_s20 + $0xa8] sm:$0xff] %v280_v21 }
  0x28   : > { %283 = vst [vmem:[%s1241_s20 + $0xb0] sm:$0xff] %v282_v22  ;;  %285 = vst [vmem:[%s1241_s20 + $0xb8] sm:$0xff] %v284_v23  ;;  %v286_v24 = vld [vmem:[%s1236_s8 + $0x180] sm:$0xff]  ;;  %v288_v25 = vld [vmem:[%s1236_s8 + $0x190] sm:$0xff] }
  0x29   : > { %v290_v26 = vld [vmem:[%s1236_s8 + $0x1a0] sm:$0xff]  ;;  %287 = vst [vmem:[%s1241_s20 + $0xc0] sm:$0xff] %v286_v24  ;;  %289 = vst [vmem:[%s1241_s20 + $0xc8] sm:$0xff] %v288_v25  ;;  %v292_v27 = vld [vmem:[%s1236_s8 + $0x1b0] sm:$0xff] }
  0x2a   : > { %291 = vst [vmem:[%s1241_s20 + $0xd0] sm:$0xff] %v290_v26  ;;  %v294_v28 = vld [vmem:[%s1236_s8 + $0x1c0] sm:$0xff]  ;;  %v296_v29 = vld [vmem:[%s1236_s8 + $0x1d0] sm:$0xff]  ;;  %293 = vst [vmem:[%s1241_s20 + $0xd8] sm:$0xff] %v292_v27 }
  0x2b   : > { %295 = vst [vmem:[%s1241_s20 + $0xe0] sm:$0xff] %v294_v28  ;;  %297 = vst [vmem:[%s1241_s20 + $0xe8] sm:$0xff] %v296_v29  ;;  %v298_v30 = vld [vmem:[%s1236_s8 + $0x1e0] sm:$0xff]  ;;  %v300_v31 = vld [vmem:[%s1236_s8 + $0x1f0] sm:$0xff] }
  0x2c   : > { %v302_v32 = vld [vmem:[%s1236_s8 + $0x200] sm:$0xff]  ;;  %299 = vst [vmem:[%s1241_s20 + $0xf0] sm:$0xff] %v298_v30  ;;  %301 = vst [vmem:[%s1241_s20 + $0xf8] sm:$0xff] %v300_v31  ;;  %v304_v33 = vld [vmem:[%s1236_s8 + $0x210] sm:$0xff] }
  0x2d   : > { %303 = vst [vmem:[%s1241_s20 + $0x100] sm:$0xff] %v302_v32  ;;  %v306_v34 = vld [vmem:[%s1236_s8 + $0x220] sm:$0xff]  ;;  %v308_v35 = vld [vmem:[%s1236_s8 + $0x230] sm:$0xff]  ;;  %305 = vst [vmem:[%s1241_s20 + $0x108] sm:$0xff] %v304_v33 }
  0x2e   : > { %307 = vst [vmem:[%s1241_s20 + $0x110] sm:$0xff] %v306_v34  ;;  %309 = vst [vmem:[%s1241_s20 + $0x118] sm:$0xff] %v308_v35  ;;  %v310_v36 = vld [vmem:[%s1236_s8 + $0x240] sm:$0xff]  ;;  %v312_v37 = vld [vmem:[%s1236_s8 + $0x250] sm:$0xff] }
  0x2f   : > { %v314_v38 = vld [vmem:[%s1236_s8 + $0x260] sm:$0xff]  ;;  %311 = vst [vmem:[%s1241_s20 + $0x120] sm:$0xff] %v310_v36  ;;  %313 = vst [vmem:[%s1241_s20 + $0x128] sm:$0xff] %v312_v37  ;;  %v316_v39 = vld [vmem:[%s1236_s8 + $0x270] sm:$0xff] }
  0x30   : > { %315 = vst [vmem:[%s1241_s20 + $0x130] sm:$0xff] %v314_v38  ;;  %317 = vst [vmem:[%s1241_s20 + $0x138] sm:$0xff] %v316_v39 }
  0x31 PF: > { %323 = sbr.rel (!%p1214_p6) target bundleno = 58 (0x3a), region = 58  ;;  %s325_s21 = sand.u32 (%p1214_p6), 1, %s1105_s10  }
  0x32   : > { %s905_s22 = sshll.u32 (%p1214_p6), %s1129_s16, 3  ;;  %s988_s24 = smul.u32 (%p1214_p6), 80, %s325_s21 }
  0x33   : > { %s329_s29 = scalar_lea.vmem (%p1214_p6), %s1528_s1, %s905_s22 }
  0x34   : > { %v376_v40 = vld [vmem:[%s329_s29] sm:$0xff] (%p1214_p6)  ;;  %v378_v41 = vld [vmem:[%s329_s29 + $0x10] sm:$0xff] (%p1214_p6)  ;;  %s327_s30 = scalar_lea.vmem (%p1214_p6), [#allocation3], %s988_s24 }
  0x35   : > { %v380_v42 = vld [vmem:[%s329_s29 + $0x20] sm:$0xff] (%p1214_p6)  ;;  %v382_v43 = vld [vmem:[%s329_s29 + $0x30] sm:$0xff] (%p1214_p6)  ;;  %377 = vst [vmem:[%s327_s30] sm:$0xff] (%p1214_p6), %v376_v40  ;;  %379 = vst [vmem:[%s327_s30 + $0x8] sm:$0xff] (%p1214_p6), %v378_v41 }
  0x36   : > { %v384_v44 = vld [vmem:[%s329_s29 + $0x40] sm:$0xff]  ;;  %v386_v45 = vld [vmem:[%s329_s29 + $0x50] sm:$0xff]  ;;  %381 = vst [vmem:[%s327_s30 + $0x10] sm:$0xff] %v380_v42  ;;  %383 = vst [vmem:[%s327_s30 + $0x18] sm:$0xff] %v382_v43 }
  0x37   : > { %385 = vst [vmem:[%s327_s30 + $0x20] sm:$0xff] %v384_v44  ;;  %387 = vst [vmem:[%s327_s30 + $0x28] sm:$0xff] %v386_v45  ;;  %v388_v46 = vld [vmem:[%s329_s29 + $0x60] sm:$0xff]  ;;  %v390_v47 = vld [vmem:[%s329_s29 + $0x70] sm:$0xff] }
  0x38   : > { %v392_v48 = vld [vmem:[%s329_s29 + $0x80] sm:$0xff]  ;;  %389 = vst [vmem:[%s327_s30 + $0x30] sm:$0xff] %v388_v46  ;;  %391 = vst [vmem:[%s327_s30 + $0x38] sm:$0xff] %v390_v47  ;;  %v394_v49 = vld [vmem:[%s329_s29 + $0x90] sm:$0xff] }
  0x39   : > { %393 = vst [vmem:[%s327_s30 + $0x40] sm:$0xff] %v392_v48  ;;  %395 = vst [vmem:[%s327_s30 + $0x48] sm:$0xff] %v394_v49 }
  0x3a PF: > { %p906_p10 = scmp.ge.s32.totalorder %s1133_s17, 1  ;;  %p400_p11 = scmp.lt.s32.totalorder %s1133_s17, 7 }
  0x3c   : > { %p401_p12 = pnand %p906_p10, %p400_p11 }
  0x3d   : > { %s407_s23 = sand.u32 (!%p401_p12), 1, %s1109_s11   ;;  %s414_s3 = sand.u32 (!%p401_p12), 1, %s1101_s9  }
  0x3e   : > { %404 = sbr.rel (%p401_p12) target bundleno = 135 (0x87), region = 96  ;;  %p442_p13 = scmp.lt.s32.totalorder (!%p401_p12), %s1117_s13, 2 }
  0x3f   : > { %s989_s4 = smul.u32 (!%p401_p12), 320, %s407_s23  ;;  %p444_p0 = scmp.lt.s32.totalorder (!%p401_p12), %s1121_s14, 1 }
  0x40   : > { %s990_s5 = smul.u32 (!%p401_p12), 80, %s414_s3 }
  0x41   : > { %s1331_s6 = scalar_lea.vmem (!%p401_p12), [#allocation2], %s989_s4 }
  0x42   : > { %s416_s7 = scalar_lea.vmem (!%p401_p12), [#allocation3], %s990_s5 }
  0x43   : > { %v453_v50 = vld [vmem:[%s1331_s6] sm:$0xff]  ;;  %v913_v52 = vld [vmem:[%s1331_s6 + $0x8] sm:$0xff]  ;;  %v917_v1 = vld [vmem:[%s1331_s6 + $0x10] sm:$0xff]  ;;  %s1547_s13 = smov (!%p442_p13, %s1117_s13), 2  ;;  %s1549_s14 = smov (!%p444_p0, %s1121_s14), 1 }
  0x44   : > { %v910_v51 = vld [vmem:[%s1331_s6 + $0xa0] sm:$0xff]  ;;  %v1338_v54 = vld [vmem:[%s416_s7 + $0x28] sm:$0xff]  ;;  %v1352_v0 = vld [vmem:[%s416_s7 + $0x38] sm:$0xff]  ;;  %s907_s9 = sshll.u32 %s1547_s13, 1 }
  0x45   : > { %v1336_v53 = vld [vmem:[%s416_s7] sm:$0xff]  ;;  %v1340_v55 = vld [vmem:[%s416_s7 + $0x8] sm:$0xff]  ;;  %v457_v57 = vmul.f32 %v910_v51, %v1338_v54  ;;  %v1344_v58 = vld [vmem:[%s416_s7 + $0x30] sm:$0xff]  ;;  %v460_v62 = vmul.f32 %v1338_v54, %v453_v50  ;;  %v492_v12 = vmul.f32 %v917_v1, %v1352_v0  ;;  %s1419_s11 = sadd.s32 %s907_s9, %s1549_s14 }
  0x46   : > { %v456_v56 = vmul.f32 %v453_v50, %v1336_v53  ;;  %v914_v59 = vld [vmem:[%s1331_s6 + $0xa8] sm:$0xff]  ;;  %v472_v60 = vmul.f32 %v913_v52, %v1340_v55  ;;  %v1348_v61 = vld [vmem:[%s416_s7 + $0x10] sm:$0xff]  ;;  %v461_v3 = vmul.f32 %v910_v51, %v1336_v53  ;;  %v476_v4 = vmul.f32 %v913_v52, %v1344_v58  ;;  %v1363_v10 = vld [vmem:[%s416_s7 + $0x40] sm:$0xff]  ;;  %s908_s13 = sshll.u32 %s1419_s11, 3 }
  0x47   : > { %v473_v63 = vmul.f32 %v914_v59, %v1344_v58  ;;  %v918_v2 = vld [vmem:[%s1331_s6 + $0xb0] sm:$0xff]  ;;  %v477_v5 = vmul.f32 %v914_v59, %v1340_v55  ;;  %v488_v7 = vmul.f32 %v917_v1, %v1348_v61  ;;  %v1361_v9 = vld [vmem:[%s416_s7 + $0x18] sm:$0xff]  ;;  %v1371_v17 = vld [vmem:[%s416_s7 + $0x48] sm:$0xff]  ;;  %s1442_s20 = scalar_lea.vmem %s1529_s2, %s908_s13 }
  0x48   : > { %v458_v6 = vsub.f32 %v456_v56, %v457_v57  ;;  %v489_v8 = vmul.f32 %v918_v2, %v1352_v0  ;;  %v921_v11 = vld [vmem:[%s1331_s6 + $0x18] sm:$0xff]  ;;  %v1369_v16 = vld [vmem:[%s416_s7 + $0x20] sm:$0xff]  ;;  %v462_v18 = vadd.f32 %v461_v3, %v460_v62  ;;  %v493_v24 = vmul.f32 %v918_v2, %v1348_v61  ;;  %v928_v26 = vld [vmem:[%s1331_s6 + $0x28] sm:$0xff] }
  0x49   : > { %v474_v13 = vsub.f32 %v472_v60, %v473_v63  ;;  %v922_v14 = vld [vmem:[%s1331_s6 + $0xb8] sm:$0xff]  ;;  %v504_v15 = vmul.f32 %v921_v11, %v1361_v9  ;;  %v478_v19 = vadd.f32 %v477_v5, %v476_v4  ;;  %v925_v22 = vld [vmem:[%s1331_s6 + $0x20] sm:$0xff]  ;;  %v508_v25 = vmul.f32 %v921_v11, %v1363_v10  ;;  %v929_v31 = vld [vmem:[%s1331_s6 + $0xc8] sm:$0xff] }
  0x4a   : > { %v490_v20 = vsub.f32 %v488_v7, %v489_v8  ;;  %v505_v21 = vmul.f32 %v922_v14, %v1363_v10  ;;  %v926_v23 = vld [vmem:[%s1331_s6 + $0xc0] sm:$0xff]  ;;  %v520_v28 = vmul.f32 %v925_v22, %v1369_v16  ;;  %v932_v32 = vld [vmem:[%s1331_s6 + $0x30] sm:$0xff]  ;;  %v494_v34 = vadd.f32 %v493_v24, %v492_v12  ;;  %v936_v38 = vld [vmem:[%s1331_s6 + $0x38] sm:$0xff] }
  0x4b   : > { %v475_v27 = vadd.f32 %v474_v13, %v458_v6  ;;  %v521_v29 = vmul.f32 %v926_v23, %v1371_v17  ;;  %v479_v30 = vadd.f32 %v478_v19, %v462_v18  ;;  %v509_v35 = vmul.f32 %v922_v14, %v1361_v9  ;;  %v933_v37 = vld [vmem:[%s1331_s6 + $0xd0] sm:$0xff]  ;;  %v937_v43 = vld [vmem:[%s1331_s6 + $0xd8] sm:$0xff]  ;;  %v940_v44 = vld [vmem:[%s1331_s6 + $0x40] sm:$0xff] }
  0x4c   : > { %v506_v33 = vsub.f32 %v504_v15, %v505_v21  ;;  %v524_v36 = vmul.f32 %v925_v22, %v1371_v17  ;;  %v525_v41 = vmul.f32 %v926_v23, %v1369_v16  ;;  %v548_v42 = vmul.f32 %v928_v26, %v1336_v53  ;;  %v941_v49 = vld [vmem:[%s1331_s6 + $0xe0] sm:$0xff]  ;;  %v944_v50 = vld [vmem:[%s1331_s6 + $0x48] sm:$0xff] }
  0x4d   : > { %v491_v39 = vadd.f32 %v490_v20, %v475_v27  ;;  %v522_v40 = vsub.f32 %v520_v28, %v521_v29  ;;  %v495_v45 = vadd.f32 %v494_v34, %v479_v30  ;;  %v510_v46 = vadd.f32 %v509_v35, %v508_v25  ;;  %v945_v59 = vld [vmem:[%s1331_s6 + $0xe8] sm:$0xff]  ;;  %v947_v30 = vld [vmem:[%s1331_s6 + $0x50] sm:$0xff] }
  0x4e   : > { %v549_v47 = vmul.f32 %v929_v31, %v1338_v54  ;;  %v562_v48 = vmul.f32 %v932_v32, %v1340_v55  ;;  %v526_v52 = vadd.f32 %v525_v41, %v524_v36  ;;  %v563_v56 = vmul.f32 %v933_v37, %v1344_v58  ;;  %v948_v35 = vld [vmem:[%s1331_s6 + $0xf0] sm:$0xff]  ;;  %v952_v41 = vld [vmem:[%s1331_s6 + $0xf8] sm:$0xff] }
  0x4f   : > { %v507_v51 = vadd.f32 %v506_v33, %v491_v39  ;;  %v576_v57 = vmul.f32 %v936_v38, %v1348_v61  ;;  %v511_v60 = vadd.f32 %v510_v46, %v495_v45  ;;  %v577_v63 = vmul.f32 %v937_v43, %v1352_v0  ;;  %v955_v46 = vld [vmem:[%s1331_s6 + $0x60] sm:$0xff] }
  0x50   : > { %v550_v62 = vsub.f32 %v548_v42, %v549_v47  ;;  %v590_v1 = vmul.f32 %v940_v44, %v1361_v9  ;;  %v564_v3 = vsub.f32 %v562_v48, %v563_v56  ;;  %v591_v4 = vmul.f32 %v941_v49, %v1363_v10 }
  0x51   : > { %v523_v2 = vadd.f32 %v522_v40, %v507_v51  ;;  %v604_v5 = vmul.f32 %v944_v50, %v1369_v16  ;;  %v527_v6 = vadd.f32 %v526_v52, %v511_v60  ;;  %v578_v7 = vsub.f32 %v576_v57, %v577_v63  ;;  %v951_v40 = vld [vmem:[%s1331_s6 + $0x58] sm:$0xff]  ;;  %v956_v51 = vld [vmem:[%s1331_s6 + $0x100] sm:$0xff]  ;;  %v959_v60 = vld [vmem:[%s1331_s6 + $0x68] sm:$0xff] }
  0x52   : > { %v605_v8 = vmul.f32 %v945_v59, %v1371_v17  ;;  %v552_v11 = vmul.f32 %v928_v26, %v1338_v54  ;;  %v565_v13 = vadd.f32 %v564_v3, %v550_v62  ;;  %v592_v14 = vsub.f32 %v590_v1, %v591_v4  ;;  %v960_v62 = vld [vmem:[%s1331_s6 + $0x108] sm:$0xff]  ;;  %v963_v4 = vld [vmem:[%s1331_s6 + $0x70] sm:$0xff] }
  0x53   : > { %v528_v12 = vrot.slane %v523_v2, 4  ;;  %v553_v15 = vmul.f32 %v929_v31, %v1336_v53  ;;  %v535_v18 = vrot.slane %v527_v6, 4  ;;  %v566_v20 = vmul.f32 %v932_v32, %v1344_v58 }
  0x54   : > { %v606_v19 = vsub.f32 %v604_v5, %v605_v8  ;;  %v567_v21 = vmul.f32 %v933_v37, %v1340_v55  ;;  %v579_v23 = vadd.f32 %v578_v7, %v565_v13  ;;  %v580_v25 = vmul.f32 %v936_v38, %v1352_v0 }
  0x55   : > { %v529_v22 = vadd.f32 %v528_v12, %v523_v2  ;;  %v554_v24 = vadd.f32 %v553_v15, %v552_v11  ;;  %v536_v26 = vadd.f32 %v535_v18, %v527_v6  ;;  %v581_v28 = vmul.f32 %v937_v43, %v1348_v61  ;;  %v964_v11 = vld [vmem:[%s1331_s6 + $0x110] sm:$0xff] }
  0x56   : > { %v568_v27 = vadd.f32 %v567_v21, %v566_v20  ;;  %v594_v29 = vmul.f32 %v940_v44, %v1363_v10  ;;  %v593_v32 = vadd.f32 %v592_v14, %v579_v23  ;;  %v595_v33 = vmul.f32 %v941_v49, %v1361_v9 }
  0x57   : > { %v530_v31 = vrot.slane %v529_v22, 2  ;;  %v608_v34 = vmul.f32 %v944_v50, %v1371_v17  ;;  %v537_v36 = vrot.slane %v536_v26, 2  ;;  %v582_v38 = vadd.f32 %v581_v28, %v580_v25 }
  0x58   : > { %v569_v37 = vadd.f32 %v568_v27, %v554_v24  ;;  %v609_v39 = vmul.f32 %v945_v59, %v1369_v16  ;;  %v607_v43 = vadd.f32 %v606_v19, %v593_v32  ;;  %v596_v44 = vadd.f32 %v595_v33, %v594_v29 }
  0x59   : > { %v531_v42 = vadd.f32 %v530_v31, %v529_v22  ;;  %v632_v45 = vmul.f32 %v947_v30, %v1336_v53  ;;  %v538_v47 = vadd.f32 %v537_v36, %v536_v26  ;;  %v633_v50 = vmul.f32 %v948_v35, %v1338_v54 }
  0x5a   : > { %v583_v48 = vadd.f32 %v582_v38, %v569_v37  ;;  %v610_v49 = vadd.f32 %v609_v39, %v608_v34  ;;  %v612_v56 = vrot.slane %v607_v43, 4  ;;  %v646_v57 = vmul.f32 %v951_v40, %v1340_v55 }
  0x5b   : > { %v532_v52 = vrot.slane %v531_v42, 1  ;;  %v647_v59 = vmul.f32 %v952_v41, %v1344_v58  ;;  %v539_v63 = vrot.slane %v538_v47, 1  ;;  %v634_v2 = vsub.f32 %v632_v45, %v633_v50 }
  0x5c   : > { %v597_v1 = vadd.f32 %v596_v44, %v583_v48  ;;  %v660_v3 = vmul.f32 %v955_v46, %v1348_v61  ;;  %v613_v6 = vadd.f32 %v612_v56, %v607_v43  ;;  %v661_v8 = vmul.f32 %v956_v51, %v1352_v0  ;;  %v966_v43 = vld [vmem:[%s1331_s6 + $0x78] sm:$0xff] }
  0x5d   : > { %v533_v5 = vadd.f32 %v532_v52, %v531_v42  ;;  %v648_v7 = vsub.f32 %v646_v57, %v647_v59  ;;  %v540_v12 = vadd.f32 %v539_v63, %v538_v47  ;;  %v674_v14 = vmul.f32 %v959_v60, %v1361_v9  ;;  %v967_v44 = vld [vmem:[%s1331_s6 + $0x118] sm:$0xff]  ;;  %v974_v57 = vld [vmem:[%s1331_s6 + $0x88] sm:$0xff] }
  0x5e   : > { %v611_v13 = vadd.f32 %v610_v49, %v597_v1  ;;  %v675_v15 = vmul.f32 %v960_v62, %v1363_v10  ;;  %v614_v18 = vrot.slane %v613_v6, 2  ;;  %v662_v20 = vsub.f32 %v660_v3, %v661_v8  ;;  %v971_v49 = vld [vmem:[%s1331_s6 + $0x120] sm:$0xff]  ;;  %v975_v59 = vld [vmem:[%s1331_s6 + $0x128] sm:$0xff]  ;;  %v982_v8 = vld [vmem:[%s1331_s6 + $0x98] sm:$0xff] }
  0x5f   : > { %534 = vst [vmem:[%s1442_s20] sm:$0x1] %v533_v5  ;;  %v649_v19 = vadd.f32 %v648_v7, %v634_v2  ;;  %v688_v21 = vmul.f32 %v963_v4, %v1369_v16  ;;  %541 = vst [vmem:[%s1442_s20 + $0x4] sm:$0x1] %v540_v12  ;;  %v689_v24 = vmul.f32 %v964_v11, %v1371_v17  ;;  %v978_v2 = vld [vmem:[%s1331_s6 + $0x90] sm:$0xff] }
  0x60   : > { %v619_v22 = vrot.slane %v611_v13, 4  ;;  %v676_v23 = vsub.f32 %v674_v14, %v675_v15  ;;  %v636_v25 = vmul.f32 %v947_v30, %v1338_v54  ;;  %v615_v26 = vadd.f32 %v614_v18, %v613_v6  ;;  %v979_v7 = vld [vmem:[%s1331_s6 + $0x130] sm:$0xff]  ;;  %v983_v15 = vld [vmem:[%s1331_s6 + $0x138] sm:$0xff] }
  0x61   : > { %v663_v27 = vadd.f32 %v662_v20, %v649_v19  ;;  %v637_v28 = vmul.f32 %v948_v35, %v1336_v53  ;;  %v650_v29 = vmul.f32 %v951_v40, %v1344_v58  ;;  %v690_v32 = vsub.f32 %v688_v21, %v689_v24 }
  0x62   : > { %v620_v31 = vadd.f32 %v619_v22, %v611_v13  ;;  %v651_v33 = vmul.f32 %v952_v41, %v1340_v55  ;;  %v664_v34 = vmul.f32 %v955_v46, %v1352_v0  ;;  %v616_v36 = vrot.slane %v615_v26, 1  ;;  %v970_v41 = vld [vmem:[%s1331_s6 + $0x80] sm:$0xff] }
  0x63   : > { %v677_v37 = vadd.f32 %v676_v23, %v663_v27  ;;  %v638_v38 = vadd.f32 %v637_v28, %v636_v25  ;;  %v665_v30 = vmul.f32 %v956_v51, %v1348_v61  ;;  %v678_v35 = vmul.f32 %v959_v60, %v1363_v10 }
  0x64   : > { %v621_v39 = vrot.slane %v620_v31, 2  ;;  %v652_v42 = vadd.f32 %v651_v33, %v650_v29  ;;  %v679_v40 = vmul.f32 %v960_v62, %v1361_v9  ;;  %v617_v45 = vadd.f32 %v616_v36, %v615_v26 }
  0x65   : > { %v691_v46 = vadd.f32 %v690_v32, %v677_v37  ;;  %v666_v47 = vadd.f32 %v665_v30, %v664_v34  ;;  %v692_v48 = vmul.f32 %v963_v4, %v1371_v17  ;;  %v693_v56 = vmul.f32 %v964_v11, %v1369_v16 }
  0x66   : > { %v622_v50 = vadd.f32 %v621_v39, %v620_v31  ;;  %v653_v51 = vadd.f32 %v652_v42, %v638_v38  ;;  %v680_v52 = vadd.f32 %v679_v40, %v678_v35  ;;  %618 = vst [vmem:[%s1442_s20 + $0x1] sm:$0x1] %v617_v45  ;;  %v716_v62 = vmul.f32 %v966_v43, %v1336_v53 }
  0x67   : > { %v696_v60 = vrot.slane %v691_v46, 4  ;;  %v717_v63 = vmul.f32 %v967_v44, %v1338_v54  ;;  %v730_v1 = vmul.f32 %v970_v41, %v1340_v55  ;;  %v694_v5 = vadd.f32 %v693_v56, %v692_v48 }
  0x68   : > { %v623_v3 = vrot.slane %v622_v50, 1  ;;  %v667_v4 = vadd.f32 %v666_v47, %v653_v51  ;;  %v731_v6 = vmul.f32 %v971_v49, %v1344_v58  ;;  %v744_v13 = vmul.f32 %v974_v57, %v1348_v61 }
  0x69   : > { %v697_v11 = vadd.f32 %v696_v60, %v691_v46  ;;  %v718_v12 = vsub.f32 %v716_v62, %v717_v63  ;;  %v745_v14 = vmul.f32 %v975_v59, %v1352_v0  ;;  %v758_v21 = vmul.f32 %v978_v2, %v1361_v9 }
  0x6a   : > { %v624_v18 = vadd.f32 %v623_v3, %v622_v50  ;;  %v681_v19 = vadd.f32 %v680_v52, %v667_v4  ;;  %v732_v20 = vsub.f32 %v730_v1, %v731_v6  ;;  %v759_v24 = vmul.f32 %v979_v7, %v1363_v10 }
  0x6b   : > { %v698_v22 = vrot.slane %v697_v11, 2  ;;  %v746_v23 = vsub.f32 %v744_v13, %v745_v14  ;;  %v772_v25 = vmul.f32 %v982_v8, %v1369_v16  ;;  %v773_v28 = vmul.f32 %v983_v15, %v1371_v17 }
  0x6c   : > { %625 = vst [vmem:[%s1442_s20 + $0x5] sm:$0x1] %v624_v18  ;;  %v695_v26 = vadd.f32 %v694_v5, %v681_v19  ;;  %v733_v27 = vadd.f32 %v732_v20, %v718_v12  ;;  %v720_v29 = vmul.f32 %v966_v43, %v1338_v54  ;;  %v760_v32 = vsub.f32 %v758_v21, %v759_v24 }
  0x6d   : > { %v699_v31 = vadd.f32 %v698_v22, %v697_v11  ;;  %v721_v33 = vmul.f32 %v967_v44, %v1336_v53  ;;  %v734_v34 = vmul.f32 %v970_v41, %v1344_v58  ;;  %v774_v38 = vsub.f32 %v772_v25, %v773_v28 }
  0x6e   : > { %v703_v36 = vrot.slane %v695_v26, 4  ;;  %v747_v37 = vadd.f32 %v746_v23, %v733_v27  ;;  %v735_v30 = vmul.f32 %v971_v49, %v1340_v55  ;;  %v748_v35 = vmul.f32 %v974_v57, %v1352_v0 }
  0x6f   : > { %v700_v39 = vrot.slane %v699_v31, 1  ;;  %v722_v42 = vadd.f32 %v721_v33, %v720_v29  ;;  %v749_v40 = vmul.f32 %v975_v59, %v1348_v61  ;;  %v762_v46 = vmul.f32 %v978_v2, %v1363_v10 }
  0x70   : > { %v704_v45 = vadd.f32 %v703_v36, %v695_v26  ;;  %v761_v54 = vadd.f32 %v760_v32, %v747_v37  ;;  %v736_v43 = vadd.f32 %v735_v30, %v734_v34  ;;  %v763_v58 = vmul.f32 %v979_v7, %v1361_v9 }
  0x71   : > { %v701_v53 = vadd.f32 %v700_v39, %v699_v31  ;;  %v750_v44 = vadd.f32 %v749_v40, %v748_v35  ;;  %v776_v41 = vmul.f32 %v982_v8, %v1371_v17  ;;  %v777_v49 = vmul.f32 %v983_v15, %v1369_v16 }
  0x72   : > { %v705_v47 = vrot.slane %v704_v45, 2  ;;  %v775_v55 = vadd.f32 %v774_v38, %v761_v54  ;;  %v737_v48 = vadd.f32 %v736_v43, %v722_v42  ;;  %v764_v0 = vadd.f32 %v763_v58, %v762_v46 }
  0x73   : > { %702 = vst [vmem:[%s1442_s20 + $0x2] sm:$0x1] %v701_v53  ;;  %v778_v52 = vadd.f32 %v777_v49, %v776_v41 }
  0x74   : > { %v706_v61 = vadd.f32 %v705_v47, %v704_v45  ;;  %v780_v50 = vrot.slane %v775_v55, 4  ;;  %v751_v51 = vadd.f32 %v750_v44, %v737_v48 }
  0x76   : > { %v707_v10 = vrot.slane %v706_v61, 1  ;;  %v781_v56 = vadd.f32 %v780_v50, %v775_v55  ;;  %v765_v57 = vadd.f32 %v764_v0, %v751_v51 }
  0x78   : > { %v708_v9 = vadd.f32 %v707_v10, %v706_v61  ;;  %v782_v59 = vrot.slane %v781_v56, 2  ;;  %v779_v17 = vadd.f32 %v778_v52, %v765_v57 }
  0x7a   : > { %709 = vst [vmem:[%s1442_s20 + $0x6] sm:$0x1] %v708_v9  ;;  %v783_v60 = vadd.f32 %v782_v59, %v781_v56  ;;  %v787_v62 = vrot.slane %v779_v17, 4 }
  0x7c   : > { %v784_v63 = vrot.slane %v783_v60, 1  ;;  %v788_v1 = vadd.f32 %v787_v62, %v779_v17 }
  0x7e   : > { %v785_v16 = vadd.f32 %v784_v63, %v783_v60  ;;  %v789_v2 = vrot.slane %v788_v1, 2 }
  0x80   : > { %786 = vst [vmem:[%s1442_s20 + $0x3] sm:$0x1] %v785_v16  ;;  %v790_v3 = vadd.f32 %v789_v2, %v788_v1 }
  0x82   : > { %v791_v4 = vrot.slane %v790_v3, 1 }
  0x84   : > { %v792_v5 = vadd.f32 %v791_v4, %v790_v3 }
  0x86   : > { %793 = vst [vmem:[%s1442_s20 + $0x7] sm:$0x1] %v792_v5 }
  0x87 PF: > { %s12_s17 = sadd.s32 1, %s1133_s17   ;;  %s1532_s9 = smov %s1105_s10 }
  0x88   : > { %p9_p1 = scmp.ge.s32.totalorder %s12_s17, 8   ;;  %s1533_s10 = smov %s1222_s27 }
  0x89   : > { %s1534_s11 = smov %s1113_s12  ;;  %s1535_s12 = smov %s1225_s28 }
  0x8a   : > { %s1536_s13 = smov %s1125_s15  ;;  %s1537_s14 = smov %s1129_s16 }
  0x8b   : > { %s1538_s15 = smov %s1541_s18  ;;  %s1539_s16 = smov %s1545_s19 }
  0x8c   :  { %11 = sbr.rel (!%p9_p1) target bundleno = 5 (0x5), region = 195 }

</bundles_post_ra>
